<compile_context>
chip_gen: v7x
topology: tpu7x:2x2x1
jax: 0.10.0
libtpu: 0.0.40
codegen_flags: <defaults>
</compile_context>

<pallas_src>
import jax
import jax.numpy as jnp
from jax.experimental import pallas as pl
from jax.experimental.pallas import tpu as pltpu


def residual_block_kernel(x_ref, w1_ref, w2_ref, shift_ref, o_ref):
    # Linear1 (BN1 scale pre-folded into w1, bf16 MXU, f32 accumulation) -> + shift1 -> ReLU
    h = jnp.dot(x_ref[...].astype(jnp.bfloat16), w1_ref[...],
                preferred_element_type=jnp.float32)
    h = jnp.maximum(h + shift_ref[0:1, :], 0.0)

    # TODO(synk): Dropout(0.3) in training mode needs PyTorch-matching RNG; eval mode -> identity.

    # Linear2 (BN2 scale pre-folded into w2, bf16 MXU) -> + shift2 -> residual add -> ReLU
    h2 = jnp.dot(h.astype(jnp.bfloat16), w2_ref[...],
                 preferred_element_type=jnp.float32)
    # Residual re-read straight from the input ref (no long-lived f32 x across both matmuls).
    o_ref[...] = jnp.maximum(h2 + shift_ref[1:2, :] + x_ref[...], 0.0).astype(o_ref.dtype)


def _vmem_capacity_bytes():
    try:
        return int(pltpu.get_tpu_info().vmem_capacity_bytes)
    except Exception:
        return 64 << 20  # most conservative (v7x per-TensorCore VMEM)


def _pick_tile_n(N, F, vmem_capacity, *, min_steps=4, max_tile=512):
    """Largest batch tile that (a) keeps >= min_steps grid steps so each
    TensorCore still pipelines x/out DMA after megacore sharding, (b) fits the
    double-buffered x/out tiles + in-kernel temporaries next to the resident
    weights, and (c) divides N and is a multiple of 8."""
    resident = 2 * F * F * 2 + 2 * F * 4                 # single-buffered bf16 weights + f32 shifts
    per_row = 2 * 2 * F * 4 + F * 8                      # x + out (double-buffered) + f32/bf16 temps
    budget = int(0.6 * vmem_capacity)
    vmem_rows = max(8, (budget - resident) // per_row)
    steps_cap = max(8, N // min_steps) if N >= 8 * min_steps else N
    cand = min(N, max_tile, int(vmem_rows), steps_cap)
    cand = max(8, (cand // 8) * 8)
    t = cand
    while t > 8 and N % t:
        t -= 8
    if N % t:
        t = N  # small / awkward N: one step (demo never hits this; N % 8 == 0 asserted by caller)
    return t


def _build_call(N, F, tile_n, out_dtype, w_bytes, vmem_capacity, weight_buffers):
    row_spec = pl.BlockSpec((tile_n, F), lambda i: (i, 0))       # pipelined over batch
    if weight_buffers == 1:
        # Constant index_map -> block never re-fetched -> single buffer is enough.
        mat_spec = pl.BlockSpec((F, F), lambda i: (0, 0), pipeline_mode=pl.Buffered(1))
        sft_spec = pl.BlockSpec((2, F), lambda i: (0, 0), pipeline_mode=pl.Buffered(1))
    else:
        mat_spec = pl.BlockSpec((F, F), lambda i: (0, 0))
        sft_spec = pl.BlockSpec((2, F), lambda i: (0, 0))

    # Exact footprint: weights * buffer_count + shift + double-buffered x/out tiles
    # + in-kernel temporaries (f32 h + bf16 casts), + 2 MiB headroom.
    weight_bytes = weight_buffers * (2 * F * F * w_bytes + 2 * F * 4)
    xout_bytes = 2 * (2 * tile_n * F * 4)
    temp_bytes = tile_n * F * 8
    footprint = weight_bytes + xout_bytes + temp_bytes + (2 << 20)
    vmem_limit = int(min(max(footprint, 16 << 20), int(0.85 * vmem_capacity)))

    cost = pl.CostEstimate(
        flops=2 * 2 * N * F * F,                                 # two (N,F)x(F,F) matmuls
        transcendentals=0,
        bytes_accessed=N * F * 4 + N * F * out_dtype.itemsize + 2 * F * F * w_bytes + 2 * F * 4,
    )

    return pl.pallas_call(
        residual_block_kernel,
        out_shape=jax.ShapeDtypeStruct((N, F), out_dtype),
        grid_spec=pltpu.PrefetchScalarGridSpec(
            num_scalar_prefetch=0,
            grid=(N // tile_n,),
            in_specs=[row_spec, mat_spec, mat_spec, sft_spec],
            out_specs=row_spec,
        ),
        compiler_params=pltpu.CompilerParams(
            dimension_semantics=("parallel",),
            vmem_limit_bytes=vmem_limit,
        ),
        cost_estimate=cost,
    )


def residual_block_forward(x, params, *, tile_n=None, out_dtype=None):
    """x: (N, F) float32. params: dict with bf16 BN-folded weights + (2, F) f32 shifts.
    out_dtype=jnp.bfloat16 cuts output HBM traffic if the consumer accepts it."""
    N, F = x.shape
    assert F % 128 == 0, "pad in_features to a multiple of 128 for lane-dense tiles"
    assert N % 8 == 0, "pad batch to a multiple of 8"
    out_dtype = jnp.dtype(out_dtype or x.dtype)
    w_bytes = params["w1"].dtype.itemsize

    vmem_capacity = _vmem_capacity_bytes()
    # Resident-weights scheme gate (re-derived per generation's VMEM capacity).
    resident_bytes = 2 * F * F * w_bytes + 2 * F * 4
    assert resident_bytes <= int(0.6 * vmem_capacity), (
        "Resident FxF weights do not fit VMEM for this F on this TPU generation; "
        "switch to a tiled-K / output-feature grid with an accumulator scratch."
    )  # TODO(synk): implement the tiled-K path for large F.

    if tile_n is None:
        tile_n = _pick_tile_n(N, F, vmem_capacity)
    assert N % tile_n == 0 and tile_n % 8 == 0

    args = (x, params["w1"], params["w2"], params["shift"])
    try:
        # Preferred: single-buffered resident weights (pipeline_mode=Buffered(1)).
        return _build_call(N, F, tile_n, out_dtype, w_bytes, vmem_capacity, 1)(*args)
    except Exception:
        # Fallback if this jax version rejects Buffered(1): default double buffering.
        return _build_call(N, F, tile_n, out_dtype, w_bytes, vmem_capacity, 2)(*args)


def init_params(key, in_features):
    """Deterministic synthetic parameters matching the module:
       Linear(F, F) x2  ->  W: (F, F), b: (F,)
       BatchNorm1d(F) x2 -> gamma, beta, running_mean, running_var: (F,)
    Eval-mode BN is folded:
       scale = gamma / sqrt(running_var + eps)      -> folded into the weight columns
       shift = beta + (bias - running_mean) * scale -> kept as a per-feature add
    Weights stored pre-transposed (x @ W^T) in bf16 for the MXU."""
    F_ = in_features
    eps = 1e-5
    ks = jax.random.split(key, 8)
    bound = 1.0 / jnp.sqrt(F_)

    def lin(kw, kb):
        W = jax.random.uniform(kw, (F_, F_), jnp.float32, -bound, bound)  # (out, in)
        b = jax.random.uniform(kb, (F_,), jnp.float32, -bound, bound)
        return W, b

    W1, b1 = lin(ks[0], ks[1])
    W2, b2 = lin(ks[2], ks[3])

    def bn(kg, kb):
        gamma = 1.0 + 0.1 * jax.random.normal(kg, (F_,), jnp.float32)
        beta = 0.1 * jax.random.normal(kb, (F_,), jnp.float32)
        running_mean = jnp.zeros((F_,), jnp.float32)
        running_var = jnp.ones((F_,), jnp.float32)
        return gamma, beta, running_mean, running_var

    g1, be1, rm1, rv1 = bn(ks[4], ks[5])
    g2, be2, rm2, rv2 = bn(ks[6], ks[7])

    s1 = g1 / jnp.sqrt(rv1 + eps)
    sh1 = be1 + (b1 - rm1) * s1
    s2 = g2 / jnp.sqrt(rv2 + eps)
    sh2 = be2 + (b2 - rm2) * s2

    params = {
        "w1": (W1.T * s1[None, :]).astype(jnp.bfloat16),   # (F, F): x @ (W1^T * scale1)
        "w2": (W2.T * s2[None, :]).astype(jnp.bfloat16),
        "shift": jnp.stack([sh1, sh2], axis=0),            # (2, F) f32
    }
    raw = (W1, b1, W2, b2, g1, be1, rm1, rv1, g2, be2, rm2, rv2, eps)
    return params, raw


def reference_forward_f32(x, raw):
    """Pure-JAX f32 reference with eval-mode PyTorch semantics."""
    W1, b1, W2, b2, g1, be1, rm1, rv1, g2, be2, rm2, rv2, eps = raw
    h = x @ W1.T + b1
    h = (h - rm1) / jnp.sqrt(rv1 + eps) * g1 + be1
    h = jnp.maximum(h, 0.0)
    h2 = h @ W2.T + b2
    h2 = (h2 - rm2) / jnp.sqrt(rv2 + eps) * g2 + be2
    return jnp.maximum(h2 + x, 0.0)


def reference_forward_bf16(x, params):
    """Same bf16 quantization as the kernel (tight check of the fused epilogue)."""
    h = jnp.dot(x.astype(jnp.bfloat16), params["w1"], preferred_element_type=jnp.float32)
    h = jnp.maximum(h + params["shift"][0:1, :], 0.0)
    h2 = jnp.dot(h.astype(jnp.bfloat16), params["w2"], preferred_element_type=jnp.float32)
    h2 = h2 + params["shift"][1:2, :]
    return jnp.maximum(h2 + x, 0.0)


if __name__ == "__main__":
    key = jax.random.PRNGKey(0)
    kx, kp = jax.random.split(key)

    # Lane-dense feature dim (multiple of 128). N=256 with the auto-picked
    # tile_n=64 gives 4 grid steps -> >= 2 steps per TensorCore on v7x.
    # (Demo sizes are small; tune tile_n / dtypes at production N >= 8192.)
    N, F_ = 256, 256
    x = jax.random.normal(kx, (N, F_), jnp.float32)

    params, raw = init_params(kp, F_)

    out = residual_block_forward(x, params)           # f32 output for tolerance checks
    out = jax.block_until_ready(out)
    assert out.shape == (N, F_)

    # Tight check vs a reference using the same bf16 operands (verifies the fusion itself).
    ref_bf16 = reference_forward_bf16(x, params)
    assert jnp.allclose(out, ref_bf16, atol=2e-3, rtol=2e-3), "mismatch vs bf16-matched reference"

    # Looser check vs full-f32 module semantics (difference = bf16 MXU quantization only).
    ref_f32 = reference_forward_f32(x, raw)
    assert jnp.allclose(out, ref_f32, atol=1e-1, rtol=1e-1), "mismatch vs f32 reference"

    print("KERNEL_OK")
</pallas_src>

<mosaic_0001>
module attributes {stable_mosaic.version = 11 : i64} {
  func.func @residual_block_kernel(%arg0: i32, %arg1: memref<64x256xf32, #tpu.memory_space<vmem>>, %arg2: memref<256x256xbf16, #tpu.memory_space<vmem>>, %arg3: memref<256x256xbf16, #tpu.memory_space<vmem>>, %arg4: memref<2x256xf32, #tpu.memory_space<vmem>>, %arg5: memref<64x256xf32, #tpu.memory_space<vmem>>) attributes {dimension_semantics = [#tpu.dimension_semantics<parallel>], iteration_bounds = array<i64: 4>, scalar_prefetch = 0 : i64, scratch_operands = 0 : i64, tpu.core_type = #tpu.core_type<tc>, window_params = [{transform_indices = @transform_0, window_bounds = array<i64: 64, 256>}, {pipeline_mode = #tpu.pipeline_mode<synchronous>, transform_indices = @transform_1, window_bounds = array<i64: 256, 256>}, {pipeline_mode = #tpu.pipeline_mode<synchronous>, transform_indices = @transform_2, window_bounds = array<i64: 256, 256>}, {pipeline_mode = #tpu.pipeline_mode<synchronous>, transform_indices = @transform_3, window_bounds = array<i64: 2, 256>}, {transform_indices = @transform_4, window_bounds = array<i64: 64, 256>}]} {
    %c0 = arith.constant 0 : index
    %c0_0 = arith.constant 0 : index
    %0 = vector.load %arg1[%c0, %c0_0] : memref<64x256xf32, #tpu.memory_space<vmem>>, vector<64x256xf32>
    %1 = arith.truncf %0 : vector<64x256xf32> to vector<64x256xbf16>
    %c0_1 = arith.constant 0 : index
    %c0_2 = arith.constant 0 : index
    %2 = vector.load %arg2[%c0_1, %c0_2] : memref<256x256xbf16, #tpu.memory_space<vmem>>, vector<256x256xbf16>
    %cst = arith.constant dense<0.000000e+00> : vector<64x256xf32>
    %3 = tpu.matmul %1, %2, %cst {dimension_numbers = #tpu.dot_dimension_numbers<[1], [0], [0], [1], [0, 0, 1, 1], [], []>} : vector<64x256xbf16>, vector<256x256xbf16>, vector<64x256xf32> -> vector<64x256xf32>
    %c0_3 = arith.constant 0 : index
    %c0_4 = arith.constant 0 : index
    %4 = vector.load %arg4[%c0_3, %c0_4] : memref<2x256xf32, #tpu.memory_space<vmem>>, vector<1x256xf32>
    %5 = vector.broadcast %4 : vector<1x256xf32> to vector<64x256xf32>
    %6 = arith.addf %3, %5 : vector<64x256xf32>
    %cst_5 = arith.constant 0.000000e+00 : f32
    %7 = vector.broadcast %cst_5 : f32 to vector<64x256xf32>
    %8 = arith.maximumf %6, %7 : vector<64x256xf32>
    %9 = arith.truncf %8 : vector<64x256xf32> to vector<64x256xbf16>
    %c0_6 = arith.constant 0 : index
    %c0_7 = arith.constant 0 : index
    %10 = vector.load %arg3[%c0_6, %c0_7] : memref<256x256xbf16, #tpu.memory_space<vmem>>, vector<256x256xbf16>
    %cst_8 = arith.constant dense<0.000000e+00> : vector<64x256xf32>
    %11 = tpu.matmul %9, %10, %cst_8 {dimension_numbers = #tpu.dot_dimension_numbers<[1], [0], [0], [1], [0, 0, 1, 1], [], []>} : vector<64x256xbf16>, vector<256x256xbf16>, vector<64x256xf32> -> vector<64x256xf32>
    %c1 = arith.constant 1 : index
    %c0_9 = arith.constant 0 : index
    %12 = vector.load %arg4[%c1, %c0_9] : memref<2x256xf32, #tpu.memory_space<vmem>>, vector<1x256xf32>
    %13 = vector.broadcast %12 : vector<1x256xf32> to vector<64x256xf32>
    %14 = arith.addf %11, %13 : vector<64x256xf32>
    %c0_10 = arith.constant 0 : index
    %c0_11 = arith.constant 0 : index
    %15 = vector.load %arg1[%c0_10, %c0_11] : memref<64x256xf32, #tpu.memory_space<vmem>>, vector<64x256xf32>
    %16 = arith.addf %14, %15 : vector<64x256xf32>
    %cst_12 = arith.constant 0.000000e+00 : f32
    %17 = vector.broadcast %cst_12 : f32 to vector<64x256xf32>
    %18 = arith.maximumf %16, %17 : vector<64x256xf32>
    %c0_13 = arith.constant 0 : index
    %c0_14 = arith.constant 0 : index
    %19 = vector.load %arg5[%c0_13, %c0_14] : memref<64x256xf32, #tpu.memory_space<vmem>>, vector<64x256xf32>
    tpu.vector_store %arg5[%c0_13, %c0_14], %18 {strides = array<i32>} : memref<64x256xf32, #tpu.memory_space<vmem>>, vector<64x256xf32>,
    return
  }
  func.func @transform_0(%arg0: i32) -> (i32, i32) {
    %c0_i32 = arith.constant 0 : i32
    %c0_i32_0 = arith.constant 0 : i32
    return %arg0, %c0_i32 : i32, i32
  }
  func.func @transform_1(%arg0: i32) -> (i32, i32) {
    %c0_i32 = arith.constant 0 : i32
    %c0_i32_0 = arith.constant 0 : i32
    %c0_i32_1 = arith.constant 0 : i32
    return %c0_i32, %c0_i32_0 : i32, i32
  }
  func.func @transform_2(%arg0: i32) -> (i32, i32) {
    %c0_i32 = arith.constant 0 : i32
    %c0_i32_0 = arith.constant 0 : i32
    %c0_i32_1 = arith.constant 0 : i32
    return %c0_i32, %c0_i32_0 : i32, i32
  }
  func.func @transform_3(%arg0: i32) -> (i32, i32) {
    %c0_i32 = arith.constant 0 : i32
    %c0_i32_0 = arith.constant 0 : i32
    %c0_i32_1 = arith.constant 0 : i32
    return %c0_i32, %c0_i32_0 : i32, i32
  }
  func.func @transform_4(%arg0: i32) -> (i32, i32) {
    %c0_i32 = arith.constant 0 : i32
    %c0_i32_0 = arith.constant 0 : i32
    return %arg0, %c0_i32 : i32, i32
  }
}

module attributes {stable_mosaic.version = 11 : i64} {
  func.func @residual_block_kernel(%arg0: i32, %arg1: memref<64x256xf32, #tpu.memory_space<vmem>>, %arg2: memref<256x256xbf16, #tpu.memory_space<vmem>>, %arg3: memref<256x256xbf16, #tpu.memory_space<vmem>>, %arg4: memref<2x256xf32, #tpu.memory_space<vmem>>, %arg5: memref<64x256xf32, #tpu.memory_space<vmem>>) attributes {dimension_semantics = [#tpu.dimension_semantics<parallel>], iteration_bounds = array<i64: 4>, scalar_prefetch = 0 : i64, scratch_operands = 0 : i64, tpu.core_type = #tpu.core_type<tc>, window_params = [{transform_indices = @transform_0, window_bounds = array<i64: 64, 256>}, {pipeline_mode = #tpu.pipeline_mode<synchronous>, transform_indices = @transform_1, window_bounds = array<i64: 256, 256>}, {pipeline_mode = #tpu.pipeline_mode<synchronous>, transform_indices = @transform_2, window_bounds = array<i64: 256, 256>}, {pipeline_mode = #tpu.pipeline_mode<synchronous>, transform_indices = @transform_3, window_bounds = array<i64: 2, 256>}, {transform_indices = @transform_4, window_bounds = array<i64: 64, 256>}]} {
    %c0 = arith.constant 0 : index
    %c0_0 = arith.constant 0 : index
    %0 = vector.load %arg1[%c0, %c0_0] : memref<64x256xf32, #tpu.memory_space<vmem>>, vector<64x256xf32>
    %1 = arith.truncf %0 : vector<64x256xf32> to vector<64x256xbf16>
    %c0_1 = arith.constant 0 : index
    %c0_2 = arith.constant 0 : index
    %2 = vector.load %arg2[%c0_1, %c0_2] : memref<256x256xbf16, #tpu.memory_space<vmem>>, vector<256x256xbf16>
    %cst = arith.constant dense<0.000000e+00> : vector<64x256xf32>
    %3 = tpu.matmul %1, %2, %cst {dimension_numbers = #tpu.dot_dimension_numbers<[1], [0], [0], [1], [0, 0, 1, 1], [], []>} : vector<64x256xbf16>, vector<256x256xbf16>, vector<64x256xf32> -> vector<64x256xf32>
    %c0_3 = arith.constant 0 : index
    %c0_4 = arith.constant 0 : index
    %4 = vector.load %arg4[%c0_3, %c0_4] : memref<2x256xf32, #tpu.memory_space<vmem>>, vector<1x256xf32>
    %5 = vector.broadcast %4 : vector<1x256xf32> to vector<64x256xf32>
    %6 = arith.addf %3, %5 : vector<64x256xf32>
    %cst_5 = arith.constant 0.000000e+00 : f32
    %7 = vector.broadcast %cst_5 : f32 to vector<64x256xf32>
    %8 = arith.maximumf %6, %7 : vector<64x256xf32>
    %9 = arith.truncf %8 : vector<64x256xf32> to vector<64x256xbf16>
    %c0_6 = arith.constant 0 : index
    %c0_7 = arith.constant 0 : index
    %10 = vector.load %arg3[%c0_6, %c0_7] : memref<256x256xbf16, #tpu.memory_space<vmem>>, vector<256x256xbf16>
    %cst_8 = arith.constant dense<0.000000e+00> : vector<64x256xf32>
    %11 = tpu.matmul %9, %10, %cst_8 {dimension_numbers = #tpu.dot_dimension_numbers<[1], [0], [0], [1], [0, 0, 1, 1], [], []>} : vector<64x256xbf16>, vector<256x256xbf16>, vector<64x256xf32> -> vector<64x256xf32>
    %c1 = arith.constant 1 : index
    %c0_9 = arith.constant 0 : index
    %12 = vector.load %arg4[%c1, %c0_9] : memref<2x256xf32, #tpu.memory_space<vmem>>, vector<1x256xf32>
    %13 = vector.broadcast %12 : vector<1x256xf32> to vector<64x256xf32>
    %14 = arith.addf %11, %13 : vector<64x256xf32>
    %c0_10 = arith.constant 0 : index
    %c0_11 = arith.constant 0 : index
    %15 = vector.load %arg1[%c0_10, %c0_11] : memref<64x256xf32, #tpu.memory_space<vmem>>, vector<64x256xf32>
    %16 = arith.addf %14, %15 : vector<64x256xf32>
    %cst_12 = arith.constant 0.000000e+00 : f32
    %17 = vector.broadcast %cst_12 : f32 to vector<64x256xf32>
    %18 = arith.maximumf %16, %17 : vector<64x256xf32>
    %c0_13 = arith.constant 0 : index
    %c0_14 = arith.constant 0 : index
    %19 = vector.load %arg5[%c0_13, %c0_14] : memref<64x256xf32, #tpu.memory_space<vmem>>, vector<64x256xf32>
    tpu.vector_store %arg5[%c0_13, %c0_14], %18 {strides = array<i32>} : memref<64x256xf32, #tpu.memory_space<vmem>>, vector<64x256xf32>,
    return
  }
  func.func @transform_0(%arg0: i32) -> (i32, i32) {
    %c0_i32 = arith.constant 0 : i32
    %c0_i32_0 = arith.constant 0 : i32
    return %arg0, %c0_i32 : i32, i32
  }
  func.func @transform_1(%arg0: i32) -> (i32, i32) {
    %c0_i32 = arith.constant 0 : i32
    %c0_i32_0 = arith.constant 0 : i32
    %c0_i32_1 = arith.constant 0 : i32
    return %c0_i32, %c0_i32_0 : i32, i32
  }
  func.func @transform_2(%arg0: i32) -> (i32, i32) {
    %c0_i32 = arith.constant 0 : i32
    %c0_i32_0 = arith.constant 0 : i32
    %c0_i32_1 = arith.constant 0 : i32
    return %c0_i32, %c0_i32_0 : i32, i32
  }
  func.func @transform_3(%arg0: i32) -> (i32, i32) {
    %c0_i32 = arith.constant 0 : i32
    %c0_i32_0 = arith.constant 0 : i32
    %c0_i32_1 = arith.constant 0 : i32
    return %c0_i32, %c0_i32_0 : i32, i32
  }
  func.func @transform_4(%arg0: i32) -> (i32, i32) {
    %c0_i32 = arith.constant 0 : i32
    %c0_i32_0 = arith.constant 0 : i32
    return %arg0, %c0_i32 : i32, i32
  }
}

</mosaic_0001>

<bundles_post_ra>
// kernel: tpu_custom_call.1
= control target key start
LH: loop header
LB: loop body
LE: loop exit
PB: predicated region body
PF: predicated region fallthrough
CT: control target
= control target key end

     0   :  { %9 = vsyncpa [#allocation3], 0  ;;  %s1825_s0 = inlined_call_operand.hbm [shape: f32[256,256], index: 0, kind: input, shape index: {}]   ;;  %s1826_s1 = inlined_call_operand.hbm [shape: bf16[256,256], index: 1, kind: input, shape index: {}]   ;;  %s1827_s2 = inlined_call_operand.hbm [shape: bf16[256,256], index: 2, kind: input, shape index: {}]   ;;  %s1828_s3 = inlined_call_operand.vmem [shape: f32[2,256], index: 3, kind: input, shape index: {}]   ;;  %s1829_s4 = inlined_call_operand.hbm [shape: f32[256,256], index: 4, kind: output, shape index: {}]  }
   0x1   :  { %11 = vsyncpa [#allocation3 + $0x1], 0 }
   0x2   :  { %12 = vsyncpa [#allocation6], 0 }
   0x3   :  { %13 = vsyncpa [#allocation4], 0 }
   0x4   :  { %15 = vsyncpa [#allocation4 + $0x1], 0  ;;  %s1457_s15 = smov 0   ;;  %s1459_s16 = smov 0  }
   0x5   :  { %s1461_s17 = smov 0   ;;  %s1463_s18 = smov 0  }
   0x6 LB: > { %s1478_s19 = sadd.s32 4294967295, %s1420_s18   ;;  %s1006_s20 = sadd.s32 4294967294, %s1420_s18   ;;  %s1420_s18 = sphi %s1463_s18, %s1848_s18   ;;  %s1416_s17 = sphi %s1461_s17, %s1847_s17   ;;  %s1412_s16 = sphi %s1459_s16, %s1846_s16   ;;  %s1408_s15 = sphi %s1457_s15, %s1845_s15  }
   0x7   : > { %p41_p0 = scmp.ne.s32.totalorder %s1412_s16, %s1408_s15  ;;  %p1830_p1 = scmp.eq.s32.totalorder %s1478_s19, 0 }
   0x8   : > { %p134_p3 = scmp.eq.s32.totalorder %s1006_s20, 3  ;;  %p1007_p5 = scmp.ge.s32.totalorder %s1420_s18, 1 }
   0x9   : > { %p1487_p4 = por %p1830_p1, %p41_p0  ;;  %p141_p7 = scmp.lt.s32.totalorder %s1420_s18, 5 }
   0xa   : > { %p1492_p6 = por %p134_p3, %p41_p0  ;;  %s1422_s24 = smov [#allocation5]  }
   0xb   : > { %s1833_s21 = scalar_select %p1487_p4, 1, 0 }
   0xc   : > { %s1834_s22 = scalar_select %p1492_p6, 1, 0 }
   0xd   : > { %p1497_p8 = pnand %p1007_p5, %p141_p7  ;;  %s153_s25 = sshll.u32 %s1422_s24, 4  ;;  %s154_s25 = int_to_ptr.vmem [resolvable:$true] %s153_s25 }
   0xe   : > { %s1423_s27 = smov [#allocation7]   ;;  %s1264_s5 = scalar_lea.hbm %s1826_s1, 4096 }
   0xf   : > { %s1835_s23 = scalar_select %p1497_p8, 1, 0 }
  0x10   : > { %p1107_p9 = pneg %p1497_p8  ;;  %s166_s28 = sshll.u32 %s1423_s27, 4  ;;  %s1509_s28 = int_to_ptr.vmem [resolvable:$true] %s166_s28 }
  0x11   : > { %p1265_p11 = scmp.ne.s32.totalorder %s1826_s1, %s1264_s5  ;;  %p1271_p3 = scmp.lt.u32.totalorder %s1264_s5, %s1826_s1 }
  0x12   : > { %p1505_p10 = pnand %p1107_p9, %p1830_p1 }
  0x14   : > { %p1266_p12 = pneg %p1505_p10 }
  0x16   : > { %p1267_p13 = pnand %p1266_p12, %p1265_p11 }
  0x18   : > { %p1268_p0 = pneg %p1267_p13 }
  0x1a   : > { %p1273_p5 = pnand %p1271_p3, %p1268_p0 }
  0x1c   : > { %1276 = shalt.err (!%p1273_p5)
}
  0x1d   : > { %s1277_s10 = scalar_lea.vmem %s154_s25, 4096  ;;  %p1285_p2 = scmp.lt.s32.totalorder %s154_s25, %s154_s25 }
  0x1e   : > { %p1278_p7 = scmp.ne.s32.totalorder %s154_s25, %s1277_s10  ;;  %p1286_p6 = scmp.lt.s32.totalorder %s1277_s10, %s1277_s10 }
  0x20   : > { %p1280_p9 = pnand %p1278_p7, %p1266_p12  ;;  %p1287_p4 = por %p1286_p6, %p1285_p2 }
  0x22   : > { %p1281_p1 = pneg %p1280_p9 }
  0x24   : > { %p1288_p8 = pnand %p1287_p4, %p1281_p1 }
  0x26   : > { %1291 = shalt.err (!%p1288_p8)
}
  0x27   : > { %s1424_s11 = smov 128   ;;  %s1425_s12 = smov 8  }
  0x28   : > { %1110 = dma.hbm_to_vmem [thread:$0]  (!%p1505_p10), %s1826_s1, 4096, %s154_s25, [#allocation6], %s1424_s11, %s1424_s11, %s1425_s12  }
  0x29   : > { %s1292_s27 = scalar_lea.hbm %s1827_s2, 4096 }
  0x2a   : > { %p1293_p11 = scmp.ne.s32.totalorder %s1827_s2, %s1292_s27  ;;  %p1299_p4 = scmp.lt.u32.totalorder %s1292_s27, %s1827_s2 }
  0x2c   : > { %p1295_p1 = pnand %p1293_p11, %p1266_p12 }
  0x2e   : > { %p1296_p2 = pneg %p1295_p1 }
  0x30   : > { %p1301_p6 = pnand %p1299_p4, %p1296_p2 }
  0x32   : > { %1304 = shalt.err (!%p1301_p6)
}
  0x33   : > { %s1305_s25 = scalar_lea.vmem %s1509_s28, 4096  ;;  %p1313_p3 = scmp.lt.s32.totalorder %s1509_s28, %s1509_s28 }
  0x34   : > { %p1306_p8 = scmp.ne.s32.totalorder %s1509_s28, %s1305_s25  ;;  %p1314_p5 = scmp.lt.s32.totalorder %s1305_s25, %s1305_s25 }
  0x36   : > { %p1308_p13 = pnand %p1306_p8, %p1266_p12  ;;  %p1315_p7 = por %p1314_p5, %p1313_p3 }
  0x38   : > { %p1309_p0 = pneg %p1308_p13 }
  0x3a   : > { %p1316_p9 = pnand %p1315_p7, %p1309_p0 }
  0x3c   : > { %1319 = shalt.err (!%p1316_p9)
}
  0x3d   : > { %1113 = dma.hbm_to_vmem [thread:$0]  (!%p1505_p10), %s1827_s2, 4096, %s1509_s28, [#allocation6], %s1424_s11, %s1424_s11, %s1425_s12  }
  0x3e   : > { %s1559_s9 = sadd.s32 1, %s1420_s18   ;;  %s28_s26 = sadd.s32 1, %s1416_s17 }
  0x3f   : > { %s25_s10 = ssub.s32 %s1420_s18, %s1559_s9  ;;  %p35_p12 = scmp.ne.s32.totalorder %s1416_s17, %s1412_s16 }
  0x40   : > { %p26_p11 = scmp.eq.s32.totalorder %s25_s10, 0  ;;  %p36_p1 = scmp.eq.s32.totalorder %s1420_s18, 0 }
  0x41   : > { %p1837_p2 = scmp.eq.s32.totalorder %s1478_s19, 3  ;;  %p1124_p6 = scmp.lt.s32.totalorder %s1420_s18, 4 }
  0x42   : > { %s1575_s14 = scalar_select %p26_p11, %s1416_s17, %s28_s26  }
  0x43   : > { %p1569_p4 = por %p1837_p2, %p35_p12  ;;  %p37_p8 = por %p36_p1, %p35_p12 }
  0x44   : > { %s183_s20 = sand.u32 1, %s1416_s17   ;;  %s1092_s28 = sshll.u32 %s1420_s18, 11 }
  0x45   : > { %s1011_s24 = sshll.u32 %s183_s20, 7  ;;  %s1582_s27 = scalar_lea.hbm %s1825_s0, %s1092_s28 }
  0x46   : > { %s187_s29 = scalar_lea.vmem [#allocation2], %s1011_s24  ;;  %p1586_p10 = pnand %p1124_p6, %p37_p8 }
  0x47   : > { %s195_s30 = sshll.u32 %s187_s29, 4  ;;  %s1590_s6 = scalar_lea.sflag [#allocation3], %s183_s20  ;;  %s1584_s30 = int_to_ptr.vmem [resolvable:$true] %s195_s30 }
  0x48   : > { %s1320_s25 = scalar_lea.hbm %s1582_s27, 2048  ;;  %p1322_p0 = pneg %p1586_p10 }
  0x49   : > { %p1321_p13 = scmp.ne.s32.totalorder %s1582_s27, %s1320_s25  ;;  %s1325_s26 = scalar_lea.hbm %s1825_s0, 8192 }
  0x4a   : > { %p1326_p7 = scmp.lt.u32.totalorder %s1582_s27, %s1825_s0  ;;  %p1327_p9 = scmp.lt.u32.totalorder %s1325_s26, %s1320_s25 }
  0x4b   : > { %p1323_p3 = pnand %p1322_p0, %p1321_p13  ;;  %p1329_p11 = scmp.lt.u32.totalorder %s1320_s25, %s1582_s27 }
  0x4c   : > { %p1328_p12 = por %p1327_p9, %p1326_p7 }
  0x4d   : > { %p1324_p5 = pneg %p1323_p3 }
  0x4e   : > { %p1330_p1 = por %p1329_p11, %p1328_p12 }
  0x50   : > { %p1331_p2 = pnand %p1330_p1, %p1324_p5 }
  0x52   : > { %1334 = shalt.err (!%p1331_p2)
}
  0x53   : > { %s1335_s20 = scalar_lea.vmem %s1584_s30, 2048  ;;  %s1426_s28 = smov [#allocation2]  }
  0x54   : > { %p1336_p6 = scmp.ne.s32.totalorder %s1584_s30, %s1335_s20  ;;  %s1340_s11 = sshll.u32 %s1426_s28, 4  ;;  %s1341_s11 = int_to_ptr.vmem [resolvable:$false] %s1340_s11 }
  0x55   : > { %s1342_s12 = scalar_lea.vmem %s1341_s11, 4096  ;;  %p1343_p3 = scmp.lt.s32.totalorder %s1584_s30, %s1341_s11 }
  0x56   : > { %p1338_p8 = pnand %p1336_p6, %p1322_p0  ;;  %p1344_p7 = scmp.lt.s32.totalorder %s1342_s12, %s1335_s20 }
  0x58   : > { %p1339_p13 = pneg %p1338_p8  ;;  %p1345_p9 = por %p1344_p7, %p1343_p3 }
  0x5a   : > { %p1346_p12 = pnand %p1345_p9, %p1339_p13 }
  0x5c   : > { %1349 = shalt.err (!%p1346_p12)
}
  0x5d   : > { %s1427_s29 = smov 256   ;;  %s1428_s25 = smov 16  }
  0x5e   : > { %1117 = dma.hbm_to_vmem [thread:$0]  (!%p1586_p10), %s1582_s27, 2048, %s1584_s30, %s1590_s6, %s1427_s29, %s1427_s29, %s1428_s25  }
  0x5f   : > { %p1840_p0 = scmp.ne.s32.totalorder %s1835_s23, 0 }
  0x60   : > { %s1621_s7 = sand.u32 (!%p1840_p0), 1, %s1412_s16   ;;  %p1841_p5 = scmp.ne.s32.totalorder (!%p1840_p0), %s1833_s21, 0 }
  0x61   : > { %207 = sbr.rel (%p1840_p0) target bundleno = 655 (0x28f), region = 36  ;;  %s1016_s8 = sshll.u32 (!%p1840_p0), %s1621_s7, 7 }
  0x62   : > { %s210_s26 = scalar_lea.sflag (!%p1840_p0), [#allocation3], %s1621_s7  ;;  %s1627_s10 = scalar_lea.vmem (!%p1840_p0), [#allocation2], %s1016_s8 }
  0x68   : > { %1395 = dma.done.wait (%p1841_p5), %s210_s26, 2048  }
  0x69   : > { %1397 = vsyncadd (%p1841_p5), %s210_s26, 4294965248  ;;  %p1842_p10 = scmp.eq.s32.totalorder %s1478_s19, 0 }
  0x6b   : > { %1399 = dma.done.wait (%p1842_p10), [#allocation6], 8192   ;;  %p1843_p11 = pmov %p1842_p10 }
  0x6c   : > { %v1168_v0 = vld [vmem:[#allocation5 + $0x4] ss:$8 sps:$4 sm:$0xff]   ;;  %v1170_v1 = vld [vmem:[#allocation5] ss:$8 sps:$4 sm:$0xff]   ;;  %v1171_v2 = vld [vmem:[#allocation5 + $0x14] ss:$8 sps:$4 sm:$0xff]  }
  0x6d   : > { %1401 = vsyncadd (%p1843_p11), [#allocation6], 4294959104  ;;  %476 = vmatprep.subr.bf16.mxu0 %v1168_v0  ;;  %v1173_v3 = vld [vmem:[#allocation5 + $0x10] ss:$8 sps:$4 sm:$0xff]   ;;  %v1174_v4 = vld [vmem:[#allocation5 + $0x24] ss:$8 sps:$4 sm:$0xff]  }
  0x6e   : > { %477 = vmatpush1.bf16.msra.mxu0 %v1170_v1  ;;  %v1176_v5 = vld [vmem:[#allocation5 + $0x20] ss:$8 sps:$4 sm:$0xff]   ;;  %v1177_v6 = vld [vmem:[#allocation5 + $0x34] ss:$8 sps:$4 sm:$0xff]   ;;  %v1179_v7 = vld [vmem:[#allocation5 + $0x30] ss:$8 sps:$4 sm:$0xff]  }
  0x6f   : > { %478 = vmatprep.subr.bf16.mxu0 %v1171_v2  ;;  %v1180_v8 = vld [vmem:[#allocation5 + $0x44] ss:$8 sps:$4 sm:$0xff]   ;;  %v1182_v9 = vld [vmem:[#allocation5 + $0x40] ss:$8 sps:$4 sm:$0xff]   ;;  %v1183_v10 = vld [vmem:[#allocation5 + $0x54] ss:$8 sps:$4 sm:$0xff]  }
  0x70   : > { %v1185_v11 = vld [vmem:[#allocation5 + $0x50] ss:$8 sps:$4 sm:$0xff]   ;;  %v1186_v12 = vld [vmem:[#allocation5 + $0x64] ss:$8 sps:$4 sm:$0xff]   ;;  %v1188_v16 = vld [vmem:[#allocation5 + $0x60] ss:$8 sps:$4 sm:$0xff]  }
  0x71   : > { %v1638_v13 = vld [vmem:[%s1627_s10 + $0x8] sm:$0xff]  ;;  %v1641_v14 = vld [vmem:[%s1627_s10 + $0x18] sm:$0xff]  ;;  %v1646_v53 = vld [vmem:[%s1627_s10] sm:$0xff]  ;;  %s1733_s5 = scalar_lea.vmem [#allocation8], %s1016_s8  ;;  %s1094_s6 = sshll.u32 %s1478_s19, 11 }
  0x72   : > { %479 = vmatpush1.bf16.msra.mxu0 %v1173_v3  ;;  %v265_v15 = vpack.c.bf16 %v1641_v14, %v1638_v13  ;;  %v1189_v17 = vld [vmem:[#allocation5 + $0x74] ss:$8 sps:$4 sm:$0xff]   ;;  %v1191_v18 = vld [vmem:[#allocation5 + $0x70] ss:$8 sps:$4 sm:$0xff]   ;;  %v1192_v19 = vld [vmem:[#allocation5 + $0x84] ss:$8 sps:$4 sm:$0xff]   ;;  %s1777_s11 = scalar_lea.hbm %s1829_s4, %s1094_s6 }
  0x73   : > { %480 = vmatprep.subr.bf16.mxu0 %v1174_v4  ;;  %v1216_v20 = vld [vmem:[#allocation7 + $0x4] ss:$8 sps:$4 sm:$0xff]   ;;  %v1218_v21 = vld [vmem:[#allocation7] ss:$8 sps:$4 sm:$0xff]   ;;  %v1219_v22 = vld [vmem:[#allocation7 + $0x14] ss:$8 sps:$4 sm:$0xff]  }
  0x74   : > { %508 = vmatprep.mubr.bf16.mxu0 %v265_v15  ;;  %778 = vmatprep.subr.bf16.mxu1 %v1216_v20  ;;  %v1221_v23 = vld [vmem:[#allocation7 + $0x10] ss:$8 sps:$4 sm:$0xff]   ;;  %v1194_v24 = vld [vmem:[#allocation5 + $0x80] ss:$8 sps:$4 sm:$0xff]   ;;  %v1222_v25 = vld [vmem:[#allocation7 + $0x24] ss:$8 sps:$4 sm:$0xff]  }
  0x75   : > { %779 = vmatpush1.bf16.msra.mxu1 %v1218_v21  ;;  %v1195_v26 = vld [vmem:[#allocation5 + $0x94] ss:$8 sps:$4 sm:$0xff]   ;;  %v1224_v27 = vld [vmem:[#allocation7 + $0x20] ss:$8 sps:$4 sm:$0xff]   ;;  %v1197_v28 = vld [vmem:[#allocation5 + $0x90] ss:$8 sps:$4 sm:$0xff]  }
  0x76   : > { %481 = vmatpush1.bf16.msra.mxu0 %v1176_v5  ;;  %780 = vmatprep.subr.bf16.mxu1 %v1219_v22  ;;  %v1225_v29 = vld [vmem:[#allocation7 + $0x34] ss:$8 sps:$4 sm:$0xff]   ;;  %v1198_v30 = vld [vmem:[#allocation5 + $0xa4] ss:$8 sps:$4 sm:$0xff]   ;;  %v1227_v31 = vld [vmem:[#allocation7 + $0x30] ss:$8 sps:$4 sm:$0xff]  }
  0x77   : > { %482 = vmatprep.subr.bf16.mxu0 %v1177_v6  ;;  %v1200_v32 = vld [vmem:[#allocation5 + $0xa0] ss:$8 sps:$4 sm:$0xff]   ;;  %v1228_v33 = vld [vmem:[#allocation7 + $0x44] ss:$8 sps:$4 sm:$0xff]   ;;  %v1201_v34 = vld [vmem:[#allocation5 + $0xb4] ss:$8 sps:$4 sm:$0xff]  }
  0x78   : > { %v1230_v35 = vld [vmem:[#allocation7 + $0x40] ss:$8 sps:$4 sm:$0xff]   ;;  %v1203_v36 = vld [vmem:[#allocation5 + $0xb0] ss:$8 sps:$4 sm:$0xff]   ;;  %v1231_v37 = vld [vmem:[#allocation7 + $0x54] ss:$8 sps:$4 sm:$0xff]  }
  0x79   : > { %781 = vmatpush1.bf16.msra.mxu1 %v1221_v23  ;;  %v1204_v38 = vld [vmem:[#allocation5 + $0xc4] ss:$8 sps:$4 sm:$0xff]   ;;  %v1233_v39 = vld [vmem:[#allocation7 + $0x50] ss:$8 sps:$4 sm:$0xff]   ;;  %v1206_v40 = vld [vmem:[#allocation5 + $0xc0] ss:$8 sps:$4 sm:$0xff]  }
  0x7a   : > { %483 = vmatpush1.bf16.msra.mxu0 %v1179_v7  ;;  %782 = vmatprep.subr.bf16.mxu1 %v1222_v25  ;;  %v1234_v41 = vld [vmem:[#allocation7 + $0x64] ss:$8 sps:$4 sm:$0xff]   ;;  %v1207_v42 = vld [vmem:[#allocation5 + $0xd4] ss:$8 sps:$4 sm:$0xff]   ;;  %v1236_v43 = vld [vmem:[#allocation7 + $0x60] ss:$8 sps:$4 sm:$0xff]  }
  0x7b   : > { %484 = vmatprep.subr.bf16.mxu0 %v1180_v8  ;;  %v1209_v44 = vld [vmem:[#allocation5 + $0xd0] ss:$8 sps:$4 sm:$0xff]   ;;  %v1237_v45 = vld [vmem:[#allocation7 + $0x74] ss:$8 sps:$4 sm:$0xff]   ;;  %v1210_v46 = vld [vmem:[#allocation5 + $0xe4] ss:$8 sps:$4 sm:$0xff]  }
  0x7c   : > { %v1239_v47 = vld [vmem:[#allocation7 + $0x70] ss:$8 sps:$4 sm:$0xff]   ;;  %v1212_v48 = vld [vmem:[#allocation5 + $0xe0] ss:$8 sps:$4 sm:$0xff]   ;;  %v1240_v49 = vld [vmem:[#allocation7 + $0x84] ss:$8 sps:$4 sm:$0xff]  }
  0x7d   : > { %783 = vmatpush1.bf16.msra.mxu1 %v1224_v27  ;;  %v1213_v50 = vld [vmem:[#allocation5 + $0xf4] ss:$8 sps:$4 sm:$0xff]   ;;  %v1215_v51 = vld [vmem:[#allocation5 + $0xf0] ss:$8 sps:$4 sm:$0xff]   ;;  %v1242_v52 = vld [vmem:[#allocation7 + $0x80] ss:$8 sps:$4 sm:$0xff]  }
  0x7e   : > { %485 = vmatpush1.bf16.msra.mxu0 %v1182_v9  ;;  %784 = vmatprep.subr.bf16.mxu1 %v1225_v29  ;;  %v1649_v54 = vld [vmem:[%s1627_s10 + $0x10] sm:$0xff]  ;;  %v1652_v56 = vld [vmem:[%s1627_s10 + $0x28] sm:$0xff]  ;;  %v1655_v57 = vld [vmem:[%s1627_s10 + $0x38] sm:$0xff]  ;;  %s914_s24 = sshll.u32 %s1733_s5, 4  ;;  %s900_s19 = scalar_lea.sflag [#allocation4], %s1621_s7  ;;  %s1779_s24 = int_to_ptr.vmem [resolvable:$true] %s914_s24 }
  0x7f   : > { %486 = vmatprep.subr.bf16.mxu0 %v1183_v10  ;;  %v1243_v55 = vld [vmem:[#allocation7 + $0x94] ss:$8 sps:$4 sm:$0xff]   ;;  %v264_v58 = vpack.c.bf16 %v1649_v54, %v1646_v53  ;;  %v1245_v59 = vld [vmem:[#allocation7 + $0x90] ss:$8 sps:$4 sm:$0xff]   ;;  %v267_v60 = vpack.c.bf16 %v1655_v57, %v1652_v56  ;;  %v1246_v61 = vld [vmem:[#allocation7 + $0xa4] ss:$8 sps:$4 sm:$0xff]  }
  0x80   : > { %v1248_v62 = vld [vmem:[#allocation7 + $0xa0] ss:$8 sps:$4 sm:$0xff]   ;;  %v1665_v0 = vld [vmem:[%s1627_s10 + $0x30] sm:$0xff]  ;;  %v1671_v3 = vld [vmem:[%s1627_s10 + $0x58] sm:$0xff]  ;;  %s1350_s12 = scalar_lea.vmem %s1779_s24, 2048  ;;  %s1429_s29 = smov [#allocation8]  }
  0x81   : > { %785 = vmatpush1.bf16.msra.mxu1 %v1227_v31  ;;  %v1662_v63 = vld [vmem:[%s1627_s10 + $0x20] sm:$0xff]  ;;  %v1249_v1 = vld [vmem:[#allocation7 + $0xb4] ss:$8 sps:$4 sm:$0xff]   ;;  %v1668_v2 = vld [vmem:[%s1627_s10 + $0x48] sm:$0xff]  ;;  %p1351_p1 = scmp.ne.s32.totalorder %s1779_s24, %s1350_s12  ;;  %s1354_s25 = sshll.u32 %s1429_s29, 4  ;;  %s1355_s25 = int_to_ptr.vmem [resolvable:$false] %s1354_s25 }
  0x82   : > { %487 = vmatpush1.bf16.msra.mxu0 %v1185_v11  ;;  %786 = vmatprep.subr.bf16.mxu1 %v1228_v33  ;;  %v266_v4 = vpack.c.bf16 %v1665_v0, %v1662_v63  ;;  %v1251_v5 = vld [vmem:[#allocation7 + $0xb0] ss:$8 sps:$4 sm:$0xff]   ;;  %v269_v6 = vpack.c.bf16 %v1671_v3, %v1668_v2  ;;  %v1252_v7 = vld [vmem:[#allocation7 + $0xc4] ss:$8 sps:$4 sm:$0xff]   ;;  %v1254_v8 = vld [vmem:[#allocation7 + $0xc0] ss:$8 sps:$4 sm:$0xff]   ;;  %p1357_p8 = scmp.lt.s32.totalorder %s1779_s24, %s1355_s25 }
  0x83   : > { %488 = vmatprep.subr.bf16.mxu0 %v1186_v12  ;;  %v1678_v9 = vld [vmem:[%s1627_s10 + $0x40] sm:$0xff]  ;;  %v1681_v10 = vld [vmem:[%s1627_s10 + $0x50] sm:$0xff]  ;;  %v1684_v12 = vld [vmem:[%s1627_s10 + $0x68] sm:$0xff]  ;;  %p1352_p2 = pnand %p1351_p1, %p1569_p4  ;;  %s1356_s8 = scalar_lea.vmem %s1355_s25, 4096 }
  0x84   : > { %v1255_v11 = vld [vmem:[#allocation7 + $0xd4] ss:$8 sps:$4 sm:$0xff]   ;;  %v1257_v21 = vld [vmem:[#allocation7 + $0xd0] ss:$8 sps:$4 sm:$0xff]   ;;  %v1258_v22 = vld [vmem:[#allocation7 + $0xe4] ss:$8 sps:$4 sm:$0xff]   ;;  %p1358_p13 = scmp.lt.s32.totalorder %s1356_s8, %s1350_s12 }
  0x85   : > { %787 = vmatpush1.bf16.msra.mxu1 %v1230_v35  ;;  %v1687_v15 = vld [vmem:[%s1627_s10 + $0x78] sm:$0xff]  ;;  %v1260_v23 = vld [vmem:[#allocation7 + $0xe0] ss:$8 sps:$4 sm:$0xff]   ;;  %p1353_p6 = pneg %p1352_p2 }
  0x86   : > { %489 = vmatpush1.bf16.msra.mxu0 %v1188_v16  ;;  %788 = vmatprep.subr.bf16.mxu1 %v1231_v37  ;;  %v268_v16 = vpack.c.bf16 %v1681_v10, %v1678_v9  ;;  %v1263_v25 = vld [vmem:[#allocation7 + $0xf0] ss:$8 sps:$4 sm:$0xff]   ;;  %v304_v29 = vld [vmem:[%s1828_s3] ss:$2 sm:$0x3]  ;;  %p1359_p3 = por %p1358_p13, %p1357_p8 }
  0x87   : > { %490 = vmatprep.subr.bf16.mxu0 %v1189_v17  ;;  %v271_v17 = vpack.c.bf16 %v1687_v15, %v1684_v12 }
  0x88   : > { %p1360_p7 = pnand %p1359_p3, %p1353_p6 }
  0x89   : > { %789 = vmatpush1.bf16.msra.mxu1 %v1233_v39 }
  0x8a   : > { %491 = vmatpush1.bf16.msra.mxu0 %v1191_v18  ;;  %790 = vmatprep.subr.bf16.mxu1 %v1234_v41  ;;  %v1694_v18 = vld [vmem:[%s1627_s10 + $0x60] sm:$0xff] }
  0x8b   : > { %492 = vmatprep.subr.bf16.mxu0 %v1192_v19  ;;  %v1697_v19 = vld [vmem:[%s1627_s10 + $0x70] sm:$0xff] }
  0x8c   : > { %v270_v20 = vpack.c.bf16 %v1697_v19, %v1694_v18 }
  0x8d   : > { %791 = vmatpush1.bf16.msra.mxu1 %v1236_v43 }
  0x8e   : > { %493 = vmatpush1.bf16.msra.mxu0 %v1194_v24  ;;  %792 = vmatprep.subr.bf16.mxu1 %v1237_v45  ;;  %v1261_v24 = vld [vmem:[#allocation7 + $0xf4] ss:$8 sps:$4 sm:$0xff]  }
  0x8f   : > { %494 = vmatprep.subr.bf16.mxu0 %v1195_v26  ;;  %v306_v26 = vlaneseq }
  0x91   : > { %793 = vmatpush1.bf16.msra.mxu1 %v1239_v47  ;;  %v1701_v27 = vshrl.u32 %v306_v26, 7 }
  0x92   : > { %495 = vmatpush1.bf16.msra.mxu0 %v1197_v28  ;;  %794 = vmatprep.subr.bf16.mxu1 %v1240_v49 }
  0x93   : > { %496 = vmatprep.subr.bf16.mxu0 %v1198_v30  ;;  %v308_v28 = vsub.s32 0, %v1701_v27  ;;  %v312_v30 = vsub.s32 1, %v1701_v27 }
  0x95   : > { %795 = vmatpush1.bf16.msra.mxu1 %v1242_v52  ;;  %v309_v31 = vrot.slane %v304_v29, %v308_v28 }
  0x96   : > { %497 = vmatpush1.bf16.msra.mxu0 %v1200_v32  ;;  %796 = vmatprep.subr.bf16.mxu1 %v1243_v55  ;;  %v313_v32 = vrot.slane %v304_v29, %v312_v30 }
  0x97   : > { %498 = vmatprep.subr.bf16.mxu0 %v1201_v34 }
  0x99   : > { %797 = vmatpush1.bf16.msra.mxu1 %v1245_v59 }
  0x9a   : > { %499 = vmatpush1.bf16.msra.mxu0 %v1203_v36  ;;  %798 = vmatprep.subr.bf16.mxu1 %v1246_v61 }
  0x9b   : > { %500 = vmatprep.subr.bf16.mxu0 %v1204_v38 }
  0x9d   : > { %799 = vmatpush1.bf16.msra.mxu1 %v1248_v62 }
  0x9e   : > { %501 = vmatpush1.bf16.msra.mxu0 %v1206_v40  ;;  %800 = vmatprep.subr.bf16.mxu1 %v1249_v1 }
  0x9f   : > { %502 = vmatprep.subr.bf16.mxu0 %v1207_v42 }
  0xa1   : > { %801 = vmatpush1.bf16.msra.mxu1 %v1251_v5 }
  0xa2   : > { %503 = vmatpush1.bf16.msra.mxu0 %v1209_v44  ;;  %802 = vmatprep.subr.bf16.mxu1 %v1252_v7 }
  0xa3   : > { %504 = vmatprep.subr.bf16.mxu0 %v1210_v46 }
  0xa5   : > { %803 = vmatpush1.bf16.msra.mxu1 %v1254_v8 }
  0xa6   : > { %505 = vmatpush1.bf16.msra.mxu0 %v1212_v48  ;;  %804 = vmatprep.subr.bf16.mxu1 %v1255_v11 }
  0xa7   : > { %506 = vmatprep.subr.bf16.mxu0 %v1213_v50 }
  0xa9   : > { %805 = vmatpush1.bf16.msra.mxu1 %v1257_v21 }
  0xaa   : > { %507 = vmatpush1.bf16.msra.mxu0 %v1215_v51  ;;  %806 = vmatprep.subr.bf16.mxu1 %v1258_v22 }
  0xad   : > { %509 = vmatmul.mubr.bf16.vlgmr.msra.gmra.mrb[0].mxu0 %v264_v58  ;;  %807 = vmatpush1.bf16.msra.mxu1 %v1260_v23 }
  0xae   : > { %518 = vmatprep.mubr.bf16.mxu0 %v267_v60  ;;  %808 = vmatprep.subr.bf16.mxu1 %v1261_v24 }
  0xb1   : > { %809 = vmatpush1.bf16.msra.mxu1 %v1263_v25 }
  0xb5   : > { %519 = vmatmul.mubr.bf16.gmra.mrb[4].mxu0 %v266_v4 }
  0xb6   : > { %528 = vmatprep.mubr.bf16.mxu0 %v269_v6 }
  0xbd   : > { %529 = vmatmul.mubr.bf16.gmra.mrb[8].mxu0 %v268_v16 }
  0xbe   : > { %538 = vmatprep.mubr.bf16.mxu0 %v271_v17 }
  0xc5   : > { %539 = vmatmul.mubr.bf16.gmra.mrb[12].mxu0 %v270_v20 }
 0x180   : > { %v510_v33 = vpop.f32.mrb[0].mxu0 }
 0x181   : > { %v511_v34 = vadd.f32 %v510_v33, %v309_v31  ;;  %v512_v35 = vpop.f32.mrb[1].mxu0 }
 0x182   : > { %v513_v36 = vadd.f32 %v512_v35, %v313_v32  ;;  %v514_v37 = vpop.f32.mrb[2].mxu0 }
 0x183   : > { %v515_v38 = vadd.f32 %v514_v37, %v309_v31  ;;  %v516_v39 = vpop.f32.mrb[3].mxu0  ;;  %v549_v41 = vmax.f32 %v511_v34, 0.0 }
 0x184   : > { %v517_v40 = vadd.f32 %v516_v39, %v313_v32  ;;  %v550_v43 = vmax.f32 %v513_v36, 0.0 }
 0x185   : > { %v551_v42 = vmax.f32 %v515_v38, 0.0 }
 0x186   : > { %v552_v44 = vmax.f32 %v517_v40, 0.0 }
 0x187   : > { %v565_v45 = vpack.c.bf16 %v551_v42, %v549_v41 }
 0x188   : > { %v520_v46 = vpop.f32.mrb[4].mxu0  ;;  %v566_v47 = vpack.c.bf16 %v552_v44, %v550_v43 }
 0x189   : > { %v521_v48 = vadd.f32 %v520_v46, %v309_v31  ;;  %v522_v49 = vpop.f32.mrb[5].mxu0  ;;  %v1052_v46 = vld [vmem:[%s1828_s3 + $0x1] ss:$2 sm:$0x3] }
 0x18a   : > { %v523_v50 = vadd.f32 %v522_v49, %v313_v32  ;;  %v524_v51 = vpop.f32.mrb[6].mxu0  ;;  %810 = vmatprep.mubr.bf16.mxu1 %v566_v47  ;;  %v1717_v47 = vrot.slane %v1052_v46, %v308_v28 }
 0x18b   : > { %v525_v52 = vadd.f32 %v524_v51, %v309_v31  ;;  %v526_v55 = vpop.f32.mrb[7].mxu0  ;;  %811 = vmatmul.mubr.bf16.vlgmr.msra.gmra.mrb[0].mxu1 %v565_v45  ;;  %v553_v59 = vmax.f32 %v521_v48, 0.0 }
 0x18c   : > { %v527_v58 = vadd.f32 %v526_v55, %v313_v32  ;;  %v554_v61 = vmax.f32 %v523_v50, 0.0 }
 0x18d   : > { %v555_v60 = vmax.f32 %v525_v52, 0.0 }
 0x18e   : > { %v556_v62 = vmax.f32 %v527_v58, 0.0 }
 0x18f   : > { %v567_v1 = vpack.c.bf16 %v555_v60, %v553_v59 }
 0x190   : > { %v568_v4 = vpack.c.bf16 %v556_v62, %v554_v61  ;;  %v530_v5 = vpop.f32.mrb[8].mxu0 }
 0x191   : > { %v531_v6 = vadd.f32 %v530_v5, %v309_v31  ;;  %v532_v7 = vpop.f32.mrb[9].mxu0 }
 0x192   : > { %v533_v8 = vadd.f32 %v532_v7, %v313_v32  ;;  %v534_v11 = vpop.f32.mrb[10].mxu0  ;;  %820 = vmatprep.mubr.bf16.mxu1 %v568_v4 }
 0x193   : > { %v535_v16 = vadd.f32 %v534_v11, %v309_v31  ;;  %v536_v17 = vpop.f32.mrb[11].mxu0  ;;  %821 = vmatmul.mubr.bf16.gmra.mrb[4].mxu1 %v567_v1  ;;  %v557_v21 = vmax.f32 %v531_v6, 0.0 }
 0x194   : > { %v537_v20 = vadd.f32 %v536_v17, %v313_v32  ;;  %v558_v23 = vmax.f32 %v533_v8, 0.0 }
 0x195   : > { %v559_v22 = vmax.f32 %v535_v16, 0.0 }
 0x196   : > { %v560_v24 = vmax.f32 %v537_v20, 0.0 }
 0x197   : > { %v569_v25 = vpack.c.bf16 %v559_v22, %v557_v21 }
 0x198   : > { %v570_v26 = vpack.c.bf16 %v560_v24, %v558_v23  ;;  %v540_v29 = vpop.f32.mrb[12].mxu0 }
 0x199   : > { %v541_v33 = vadd.f32 %v540_v29, %v309_v31  ;;  %v542_v34 = vpop.f32.mrb[13].mxu0 }
 0x19a   : > { %v543_v35 = vadd.f32 %v542_v34, %v313_v32  ;;  %v544_v36 = vpop.f32.mrb[14].mxu0  ;;  %830 = vmatprep.mubr.bf16.mxu1 %v570_v26 }
 0x19b   : > { %v545_v37 = vadd.f32 %v544_v36, %v309_v31  ;;  %v546_v38 = vpop.f32.mrb[15].mxu0  ;;  %831 = vmatmul.mubr.bf16.gmra.mrb[8].mxu1 %v569_v25  ;;  %v561_v40 = vmax.f32 %v541_v33, 0.0  ;;  %v1721_v31 = vrot.slane %v1052_v46, %v312_v30 }
 0x19c   : > { %v547_v39 = vadd.f32 %v546_v38, %v313_v32  ;;  %v562_v42 = vmax.f32 %v543_v35, 0.0 }
 0x19d   : > { %v563_v41 = vmax.f32 %v545_v37, 0.0 }
 0x19e   : > { %v564_v43 = vmax.f32 %v547_v39, 0.0 }
 0x19f   : > { %v571_v44 = vpack.c.bf16 %v563_v41, %v561_v40 }
 0x1a0   : > { %v572_v45 = vpack.c.bf16 %v564_v43, %v562_v42 }
 0x1a2   : > { %840 = vmatprep.mubr.bf16.mxu1 %v572_v45 }
 0x1a3   : > { %841 = vmatmul.mubr.bf16.gmra.mrb[12].mxu1 %v571_v44 }
 0x25e   : > { %v812_v32 = vpop.f32.mrb[0].mxu1 }
 0x25f   : > { %v813_v48 = vadd.f32 %v812_v32, %v1717_v47  ;;  %v814_v49 = vpop.f32.mrb[1].mxu1 }
 0x260   : > { %v815_v50 = vadd.f32 %v814_v49, %v1721_v31  ;;  %v816_v51 = vpop.f32.mrb[2].mxu1 }
 0x261   : > { %v851_v52 = vadd.f32 %v813_v48, %v1646_v53  ;;  %v817_v55 = vadd.f32 %v816_v51, %v1717_v47  ;;  %v818_v58 = vpop.f32.mrb[3].mxu1 }
 0x262   : > { %v852_v28 = vadd.f32 %v815_v50, %v1638_v13  ;;  %v819_v59 = vadd.f32 %v818_v58, %v1721_v31 }
 0x263   : > { %v867_v27 = vmax.f32 %v851_v52, 0.0  ;;  %v853_v30 = vadd.f32 %v817_v55, %v1649_v54 }
 0x264   : > { %v868_v60 = vmax.f32 %v852_v28, 0.0  ;;  %v854_v61 = vadd.f32 %v819_v59, %v1641_v14 }
 0x265   : > { %883 = vst [vmem:[%s1733_s5] sm:$0xff] %v867_v27  ;;  %v869_v53 = vmax.f32 %v853_v30, 0.0 }
 0x266   : > { %884 = vst [vmem:[%s1733_s5 + $0x8] sm:$0xff] %v868_v60  ;;  %v870_v62 = vmax.f32 %v854_v61, 0.0  ;;  %v822_v13 = vpop.f32.mrb[4].mxu1 }
 0x267   : > { %885 = vst [vmem:[%s1733_s5 + $0x10] sm:$0xff] %v869_v53  ;;  %v823_v1 = vadd.f32 %v822_v13, %v1717_v47  ;;  %v824_v54 = vpop.f32.mrb[5].mxu1 }
 0x268   : > { %886 = vst [vmem:[%s1733_s5 + $0x18] sm:$0xff] %v870_v62  ;;  %v825_v14 = vadd.f32 %v824_v54, %v1721_v31  ;;  %v826_v4 = vpop.f32.mrb[6].mxu1 }
 0x269   : > { %v855_v5 = vadd.f32 %v823_v1, %v1662_v63  ;;  %v827_v6 = vadd.f32 %v826_v4, %v1717_v47  ;;  %v828_v7 = vpop.f32.mrb[7].mxu1 }
 0x26a   : > { %v856_v8 = vadd.f32 %v825_v14, %v1652_v56  ;;  %v829_v11 = vadd.f32 %v828_v7, %v1721_v31 }
 0x26b   : > { %v871_v16 = vmax.f32 %v855_v5, 0.0  ;;  %v857_v17 = vadd.f32 %v827_v6, %v1665_v0 }
 0x26c   : > { %v872_v20 = vmax.f32 %v856_v8, 0.0  ;;  %v858_v21 = vadd.f32 %v829_v11, %v1655_v57 }
 0x26d   : > { %887 = vst [vmem:[%s1733_s5 + $0x20] sm:$0xff] %v871_v16  ;;  %v873_v22 = vmax.f32 %v857_v17, 0.0 }
 0x26e   : > { %888 = vst [vmem:[%s1733_s5 + $0x28] sm:$0xff] %v872_v20  ;;  %v874_v23 = vmax.f32 %v858_v21, 0.0  ;;  %v832_v24 = vpop.f32.mrb[8].mxu1 }
 0x26f   : > { %889 = vst [vmem:[%s1733_s5 + $0x30] sm:$0xff] %v873_v22  ;;  %v833_v63 = vadd.f32 %v832_v24, %v1717_v47  ;;  %v834_v25 = vpop.f32.mrb[9].mxu1 }
 0x270   : > { %890 = vst [vmem:[%s1733_s5 + $0x38] sm:$0xff] %v874_v23  ;;  %v835_v56 = vadd.f32 %v834_v25, %v1721_v31  ;;  %v836_v26 = vpop.f32.mrb[10].mxu1 }
 0x271   : > { %v859_v0 = vadd.f32 %v833_v63, %v1678_v9  ;;  %v837_v57 = vadd.f32 %v836_v26, %v1717_v47  ;;  %v838_v29 = vpop.f32.mrb[11].mxu1 }
 0x272   : > { %v860_v33 = vadd.f32 %v835_v56, %v1668_v2  ;;  %v839_v34 = vadd.f32 %v838_v29, %v1721_v31 }
 0x273   : > { %v875_v35 = vmax.f32 %v859_v0, 0.0  ;;  %v861_v36 = vadd.f32 %v837_v57, %v1681_v10 }
 0x274   : > { %v876_v37 = vmax.f32 %v860_v33, 0.0  ;;  %v862_v38 = vadd.f32 %v839_v34, %v1671_v3 }
 0x275   : > { %891 = vst [vmem:[%s1733_s5 + $0x40] sm:$0xff] %v875_v35  ;;  %v877_v39 = vmax.f32 %v861_v36, 0.0 }
 0x276   : > { %892 = vst [vmem:[%s1733_s5 + $0x48] sm:$0xff] %v876_v37  ;;  %v878_v9 = vmax.f32 %v862_v38, 0.0  ;;  %v842_v40 = vpop.f32.mrb[12].mxu1 }
 0x277   : > { %893 = vst [vmem:[%s1733_s5 + $0x50] sm:$0xff] %v877_v39  ;;  %v843_v41 = vadd.f32 %v842_v40, %v1717_v47  ;;  %v844_v2 = vpop.f32.mrb[13].mxu1 }
 0x278   : > { %894 = vst [vmem:[%s1733_s5 + $0x58] sm:$0xff] %v878_v9  ;;  %v845_v42 = vadd.f32 %v844_v2, %v1721_v31  ;;  %v846_v43 = vpop.f32.mrb[14].mxu1 }
 0x279   : > { %v863_v10 = vadd.f32 %v843_v41, %v1694_v18  ;;  %v847_v3 = vadd.f32 %v846_v43, %v1717_v47  ;;  %v848_v44 = vpop.f32.mrb[15].mxu1 }
 0x27a   : > { %v864_v45 = vadd.f32 %v845_v42, %v1684_v12  ;;  %v849_v46 = vadd.f32 %v848_v44, %v1721_v31 }
 0x27b   : > { %v879_v32 = vmax.f32 %v863_v10, 0.0  ;;  %v865_v48 = vadd.f32 %v847_v3, %v1697_v19 }
 0x27c   : > { %v880_v49 = vmax.f32 %v864_v45, 0.0  ;;  %v866_v50 = vadd.f32 %v849_v46, %v1687_v15 }
 0x27d   : > { %895 = vst [vmem:[%s1733_s5 + $0x60] sm:$0xff] %v879_v32  ;;  %v881_v18 = vmax.f32 %v865_v48, 0.0 }
 0x27e   : > { %896 = vst [vmem:[%s1733_s5 + $0x68] sm:$0xff] %v880_v49  ;;  %v882_v12 = vmax.f32 %v866_v50, 0.0 }
 0x27f   : > { %897 = vst [vmem:[%s1733_s5 + $0x70] sm:$0xff] %v881_v18 }
 0x280   : > { %898 = vst [vmem:[%s1733_s5 + $0x78] sm:$0xff] %v882_v12 }
 0x281   : > { %1363 = shalt.err (!%p1360_p7)
}
 0x282   : > { %s1364_s26 = scalar_lea.hbm %s1777_s11, 2048  ;;  %s1368_s23 = scalar_lea.hbm %s1829_s4, 8192 }
 0x283   : > { %p1365_p9 = scmp.ne.s32.totalorder %s1777_s11, %s1364_s26  ;;  %p1369_p5 = scmp.lt.u32.totalorder %s1777_s11, %s1829_s4 }
 0x284   : > { %p1370_p10 = scmp.lt.u32.totalorder %s1368_s23, %s1364_s26  ;;  %p1372_p1 = scmp.lt.u32.totalorder %s1364_s26, %s1777_s11 }
 0x285   : > { %p1366_p12 = pnand %p1365_p9, %p1569_p4 }
 0x286   : > { %p1371_p11 = por %p1370_p10, %p1369_p5 }
 0x287   : > { %p1367_p0 = pneg %p1366_p12 }
 0x288   : > { %p1373_p2 = por %p1372_p1, %p1371_p11 }
 0x28a   : > { %p1374_p6 = pnand %p1373_p2, %p1367_p0 }
 0x28c   : > { %1377 = shalt.err (!%p1374_p6)
}
 0x28d   : > { %s1430_s5 = smov 256   ;;  %s1431_s6 = smov 16  }
 0x28e   : > { %1105 = dma.vmem_to_hbm [thread:$0]  (%p1569_p4), %s1779_s24, 2048, %s1777_s11, %s900_s19, %s1430_s5, %s1430_s5, %s1431_s6  }
 0x28f PF: > { %p1127_p8 = scmp.ge.s32.totalorder %s1420_s18, 2  ;;  %s929_s20 = sand.u32 1, %s1408_s15  }
 0x290   : > { %p1844_p13 = scmp.ne.s32.totalorder %s1834_s22, 0  ;;  %s930_s28 = scalar_lea.sflag [#allocation4], %s929_s20 }
 0x292   : > { %p1119_p3 = pnand %p1127_p8, %p1844_p13 }
 0x294   : > { %1403 = dma.done.wait (!%p1119_p3), %s930_s28, 2048  }
 0x295   : > { %1405 = vsyncadd (!%p1119_p3), %s930_s28, 4294965248  ;;  %p18_p7 = scmp.ge.s32.totalorder %s1559_s9, 6   ;;  %s1845_s15 = smov %s1412_s16 }
 0x296   : > { %s1846_s16 = smov %s1416_s17  ;;  %s1847_s17 = smov %s1575_s14 }
 0x297   : > { %s1848_s18 = smov %s1559_s9  ;;  %20 = sbr.rel (!%p18_p7) target bundleno = 6 (0x6), region = 90 }
 0x29e   :  { %935 = vsyncpa [#allocation3], 1 }
 0x29f   :  { %937 = vsyncpa [#allocation3 + $0x1], 1 }
 0x2a0   :  { %938 = vsyncpa [#allocation6], 1 }
 0x2a1   :  { %939 = vsyncpa [#allocation4], 1 }
 0x2a2   :  { %941 = vsyncpa [#allocation4 + $0x1], 1 }

// kernel: tpu_custom_call.1
= control target key start
LH: loop header
LB: loop body
LE: loop exit
PB: predicated region body
PF: predicated region fallthrough
CT: control target
= control target key end

     0   :  { %9 = vsyncpa [#allocation3], 0  ;;  %s1825_s0 = inlined_call_operand.hbm [shape: f32[256,256], index: 0, kind: input, shape index: {}]   ;;  %s1826_s1 = inlined_call_operand.hbm [shape: bf16[256,256], index: 1, kind: input, shape index: {}]   ;;  %s1827_s2 = inlined_call_operand.hbm [shape: bf16[256,256], index: 2, kind: input, shape index: {}]   ;;  %s1828_s3 = inlined_call_operand.vmem [shape: f32[2,256], index: 3, kind: input, shape index: {}]   ;;  %s1829_s4 = inlined_call_operand.hbm [shape: f32[256,256], index: 4, kind: output, shape index: {}]  }
   0x1   :  { %11 = vsyncpa [#allocation3 + $0x1], 0 }
   0x2   :  { %12 = vsyncpa [#allocation6], 0 }
   0x3   :  { %13 = vsyncpa [#allocation4], 0 }
   0x4   :  { %15 = vsyncpa [#allocation4 + $0x1], 0  ;;  %s1457_s15 = smov 0   ;;  %s1459_s16 = smov 0  }
   0x5   :  { %s1461_s17 = smov 0   ;;  %s1463_s18 = smov 0  }
   0x6 LB: > { %s1478_s19 = sadd.s32 4294967295, %s1420_s18   ;;  %s1006_s20 = sadd.s32 4294967294, %s1420_s18   ;;  %s1420_s18 = sphi %s1463_s18, %s1848_s18   ;;  %s1416_s17 = sphi %s1461_s17, %s1847_s17   ;;  %s1412_s16 = sphi %s1459_s16, %s1846_s16   ;;  %s1408_s15 = sphi %s1457_s15, %s1845_s15  }
   0x7   : > { %p41_p0 = scmp.ne.s32.totalorder %s1412_s16, %s1408_s15  ;;  %p1830_p1 = scmp.eq.s32.totalorder %s1478_s19, 0 }
   0x8   : > { %p134_p3 = scmp.eq.s32.totalorder %s1006_s20, 3  ;;  %p1007_p5 = scmp.ge.s32.totalorder %s1420_s18, 1 }
   0x9   : > { %p1487_p4 = por %p1830_p1, %p41_p0  ;;  %p141_p7 = scmp.lt.s32.totalorder %s1420_s18, 5 }
   0xa   : > { %p1492_p6 = por %p134_p3, %p41_p0  ;;  %s1422_s24 = smov [#allocation5]  }
   0xb   : > { %s1833_s21 = scalar_select %p1487_p4, 1, 0 }
   0xc   : > { %s1834_s22 = scalar_select %p1492_p6, 1, 0 }
   0xd   : > { %p1497_p8 = pnand %p1007_p5, %p141_p7  ;;  %s153_s25 = sshll.u32 %s1422_s24, 4  ;;  %s154_s25 = int_to_ptr.vmem [resolvable:$true] %s153_s25 }
   0xe   : > { %s1423_s27 = smov [#allocation7]   ;;  %s1264_s5 = scalar_lea.hbm %s1826_s1, 4096 }
   0xf   : > { %s1835_s23 = scalar_select %p1497_p8, 1, 0 }
  0x10   : > { %p1107_p9 = pneg %p1497_p8  ;;  %s166_s28 = sshll.u32 %s1423_s27, 4  ;;  %s1509_s28 = int_to_ptr.vmem [resolvable:$true] %s166_s28 }
  0x11   : > { %p1265_p11 = scmp.ne.s32.totalorder %s1826_s1, %s1264_s5  ;;  %p1271_p3 = scmp.lt.u32.totalorder %s1264_s5, %s1826_s1 }
  0x12   : > { %p1505_p10 = pnand %p1107_p9, %p1830_p1 }
  0x14   : > { %p1266_p12 = pneg %p1505_p10 }
  0x16   : > { %p1267_p13 = pnand %p1266_p12, %p1265_p11 }
  0x18   : > { %p1268_p0 = pneg %p1267_p13 }
  0x1a   : > { %p1273_p5 = pnand %p1271_p3, %p1268_p0 }
  0x1c   : > { %1276 = shalt.err (!%p1273_p5)
}
  0x1d   : > { %s1277_s10 = scalar_lea.vmem %s154_s25, 4096  ;;  %p1285_p2 = scmp.lt.s32.totalorder %s154_s25, %s154_s25 }
  0x1e   : > { %p1278_p7 = scmp.ne.s32.totalorder %s154_s25, %s1277_s10  ;;  %p1286_p6 = scmp.lt.s32.totalorder %s1277_s10, %s1277_s10 }
  0x20   : > { %p1280_p9 = pnand %p1278_p7, %p1266_p12  ;;  %p1287_p4 = por %p1286_p6, %p1285_p2 }
  0x22   : > { %p1281_p1 = pneg %p1280_p9 }
  0x24   : > { %p1288_p8 = pnand %p1287_p4, %p1281_p1 }
  0x26   : > { %1291 = shalt.err (!%p1288_p8)
}
  0x27   : > { %s1424_s11 = smov 128   ;;  %s1425_s12 = smov 8  }
  0x28   : > { %1110 = dma.hbm_to_vmem [thread:$0]  (!%p1505_p10), %s1826_s1, 4096, %s154_s25, [#allocation6], %s1424_s11, %s1424_s11, %s1425_s12  }
  0x29   : > { %s1292_s27 = scalar_lea.hbm %s1827_s2, 4096 }
  0x2a   : > { %p1293_p11 = scmp.ne.s32.totalorder %s1827_s2, %s1292_s27  ;;  %p1299_p4 = scmp.lt.u32.totalorder %s1292_s27, %s1827_s2 }
  0x2c   : > { %p1295_p1 = pnand %p1293_p11, %p1266_p12 }
  0x2e   : > { %p1296_p2 = pneg %p1295_p1 }
  0x30   : > { %p1301_p6 = pnand %p1299_p4, %p1296_p2 }
  0x32   : > { %1304 = shalt.err (!%p1301_p6)
}
  0x33   : > { %s1305_s25 = scalar_lea.vmem %s1509_s28, 4096  ;;  %p1313_p3 = scmp.lt.s32.totalorder %s1509_s28, %s1509_s28 }
  0x34   : > { %p1306_p8 = scmp.ne.s32.totalorder %s1509_s28, %s1305_s25  ;;  %p1314_p5 = scmp.lt.s32.totalorder %s1305_s25, %s1305_s25 }
  0x36   : > { %p1308_p13 = pnand %p1306_p8, %p1266_p12  ;;  %p1315_p7 = por %p1314_p5, %p1313_p3 }
  0x38   : > { %p1309_p0 = pneg %p1308_p13 }
  0x3a   : > { %p1316_p9 = pnand %p1315_p7, %p1309_p0 }
  0x3c   : > { %1319 = shalt.err (!%p1316_p9)
}
  0x3d   : > { %1113 = dma.hbm_to_vmem [thread:$0]  (!%p1505_p10), %s1827_s2, 4096, %s1509_s28, [#allocation6], %s1424_s11, %s1424_s11, %s1425_s12  }
  0x3e   : > { %s1559_s9 = sadd.s32 1, %s1420_s18   ;;  %s28_s26 = sadd.s32 1, %s1416_s17 }
  0x3f   : > { %s25_s10 = ssub.s32 %s1420_s18, %s1559_s9  ;;  %p35_p12 = scmp.ne.s32.totalorder %s1416_s17, %s1412_s16 }
  0x40   : > { %p26_p11 = scmp.eq.s32.totalorder %s25_s10, 0  ;;  %p36_p1 = scmp.eq.s32.totalorder %s1420_s18, 0 }
  0x41   : > { %p1837_p2 = scmp.eq.s32.totalorder %s1478_s19, 3  ;;  %p1124_p6 = scmp.lt.s32.totalorder %s1420_s18, 4 }
  0x42   : > { %s1575_s14 = scalar_select %p26_p11, %s1416_s17, %s28_s26  }
  0x43   : > { %p1569_p4 = por %p1837_p2, %p35_p12  ;;  %p37_p8 = por %p36_p1, %p35_p12 }
  0x44   : > { %s183_s20 = sand.u32 1, %s1416_s17   ;;  %s1092_s28 = sshll.u32 %s1420_s18, 11 }
  0x45   : > { %s1011_s24 = sshll.u32 %s183_s20, 7  ;;  %s1582_s27 = scalar_lea.hbm %s1825_s0, %s1092_s28 }
  0x46   : > { %s187_s29 = scalar_lea.vmem [#allocation2], %s1011_s24  ;;  %p1586_p10 = pnand %p1124_p6, %p37_p8 }
  0x47   : > { %s195_s30 = sshll.u32 %s187_s29, 4  ;;  %s1590_s6 = scalar_lea.sflag [#allocation3], %s183_s20  ;;  %s1584_s30 = int_to_ptr.vmem [resolvable:$true] %s195_s30 }
  0x48   : > { %s1320_s25 = scalar_lea.hbm %s1582_s27, 2048  ;;  %p1322_p0 = pneg %p1586_p10 }
  0x49   : > { %p1321_p13 = scmp.ne.s32.totalorder %s1582_s27, %s1320_s25  ;;  %s1325_s26 = scalar_lea.hbm %s1825_s0, 8192 }
  0x4a   : > { %p1326_p7 = scmp.lt.u32.totalorder %s1582_s27, %s1825_s0  ;;  %p1327_p9 = scmp.lt.u32.totalorder %s1325_s26, %s1320_s25 }
  0x4b   : > { %p1323_p3 = pnand %p1322_p0, %p1321_p13  ;;  %p1329_p11 = scmp.lt.u32.totalorder %s1320_s25, %s1582_s27 }
  0x4c   : > { %p1328_p12 = por %p1327_p9, %p1326_p7 }
  0x4d   : > { %p1324_p5 = pneg %p1323_p3 }
  0x4e   : > { %p1330_p1 = por %p1329_p11, %p1328_p12 }
  0x50   : > { %p1331_p2 = pnand %p1330_p1, %p1324_p5 }
  0x52   : > { %1334 = shalt.err (!%p1331_p2)
}
  0x53   : > { %s1335_s20 = scalar_lea.vmem %s1584_s30, 2048  ;;  %s1426_s28 = smov [#allocation2]  }
  0x54   : > { %p1336_p6 = scmp.ne.s32.totalorder %s1584_s30, %s1335_s20  ;;  %s1340_s11 = sshll.u32 %s1426_s28, 4  ;;  %s1341_s11 = int_to_ptr.vmem [resolvable:$false] %s1340_s11 }
  0x55   : > { %s1342_s12 = scalar_lea.vmem %s1341_s11, 4096  ;;  %p1343_p3 = scmp.lt.s32.totalorder %s1584_s30, %s1341_s11 }
  0x56   : > { %p1338_p8 = pnand %p1336_p6, %p1322_p0  ;;  %p1344_p7 = scmp.lt.s32.totalorder %s1342_s12, %s1335_s20 }
  0x58   : > { %p1339_p13 = pneg %p1338_p8  ;;  %p1345_p9 = por %p1344_p7, %p1343_p3 }
  0x5a   : > { %p1346_p12 = pnand %p1345_p9, %p1339_p13 }
  0x5c   : > { %1349 = shalt.err (!%p1346_p12)
}
  0x5d   : > { %s1427_s29 = smov 256   ;;  %s1428_s25 = smov 16  }
  0x5e   : > { %1117 = dma.hbm_to_vmem [thread:$0]  (!%p1586_p10), %s1582_s27, 2048, %s1584_s30, %s1590_s6, %s1427_s29, %s1427_s29, %s1428_s25  }
  0x5f   : > { %p1840_p0 = scmp.ne.s32.totalorder %s1835_s23, 0 }
  0x60   : > { %s1621_s7 = sand.u32 (!%p1840_p0), 1, %s1412_s16   ;;  %p1841_p5 = scmp.ne.s32.totalorder (!%p1840_p0), %s1833_s21, 0 }
  0x61   : > { %207 = sbr.rel (%p1840_p0) target bundleno = 655 (0x28f), region = 36  ;;  %s1016_s8 = sshll.u32 (!%p1840_p0), %s1621_s7, 7 }
  0x62   : > { %s210_s26 = scalar_lea.sflag (!%p1840_p0), [#allocation3], %s1621_s7  ;;  %s1627_s10 = scalar_lea.vmem (!%p1840_p0), [#allocation2], %s1016_s8 }
  0x68   : > { %1395 = dma.done.wait (%p1841_p5), %s210_s26, 2048  }
  0x69   : > { %1397 = vsyncadd (%p1841_p5), %s210_s26, 4294965248  ;;  %p1842_p10 = scmp.eq.s32.totalorder %s1478_s19, 0 }
  0x6b   : > { %1399 = dma.done.wait (%p1842_p10), [#allocation6], 8192   ;;  %p1843_p11 = pmov %p1842_p10 }
  0x6c   : > { %v1168_v0 = vld [vmem:[#allocation5 + $0x4] ss:$8 sps:$4 sm:$0xff]   ;;  %v1170_v1 = vld [vmem:[#allocation5] ss:$8 sps:$4 sm:$0xff]   ;;  %v1171_v2 = vld [vmem:[#allocation5 + $0x14] ss:$8 sps:$4 sm:$0xff]  }
  0x6d   : > { %1401 = vsyncadd (%p1843_p11), [#allocation6], 4294959104  ;;  %476 = vmatprep.subr.bf16.mxu0 %v1168_v0  ;;  %v1173_v3 = vld [vmem:[#allocation5 + $0x10] ss:$8 sps:$4 sm:$0xff]   ;;  %v1174_v4 = vld [vmem:[#allocation5 + $0x24] ss:$8 sps:$4 sm:$0xff]  }
  0x6e   : > { %477 = vmatpush1.bf16.msra.mxu0 %v1170_v1  ;;  %v1176_v5 = vld [vmem:[#allocation5 + $0x20] ss:$8 sps:$4 sm:$0xff]   ;;  %v1177_v6 = vld [vmem:[#allocation5 + $0x34] ss:$8 sps:$4 sm:$0xff]   ;;  %v1179_v7 = vld [vmem:[#allocation5 + $0x30] ss:$8 sps:$4 sm:$0xff]  }
  0x6f   : > { %478 = vmatprep.subr.bf16.mxu0 %v1171_v2  ;;  %v1180_v8 = vld [vmem:[#allocation5 + $0x44] ss:$8 sps:$4 sm:$0xff]   ;;  %v1182_v9 = vld [vmem:[#allocation5 + $0x40] ss:$8 sps:$4 sm:$0xff]   ;;  %v1183_v10 = vld [vmem:[#allocation5 + $0x54] ss:$8 sps:$4 sm:$0xff]  }
  0x70   : > { %v1185_v11 = vld [vmem:[#allocation5 + $0x50] ss:$8 sps:$4 sm:$0xff]   ;;  %v1186_v12 = vld [vmem:[#allocation5 + $0x64] ss:$8 sps:$4 sm:$0xff]   ;;  %v1188_v16 = vld [vmem:[#allocation5 + $0x60] ss:$8 sps:$4 sm:$0xff]  }
  0x71   : > { %v1638_v13 = vld [vmem:[%s1627_s10 + $0x8] sm:$0xff]  ;;  %v1641_v14 = vld [vmem:[%s1627_s10 + $0x18] sm:$0xff]  ;;  %v1646_v53 = vld [vmem:[%s1627_s10] sm:$0xff]  ;;  %s1733_s5 = scalar_lea.vmem [#allocation8], %s1016_s8  ;;  %s1094_s6 = sshll.u32 %s1478_s19, 11 }
  0x72   : > { %479 = vmatpush1.bf16.msra.mxu0 %v1173_v3  ;;  %v265_v15 = vpack.c.bf16 %v1641_v14, %v1638_v13  ;;  %v1189_v17 = vld [vmem:[#allocation5 + $0x74] ss:$8 sps:$4 sm:$0xff]   ;;  %v1191_v18 = vld [vmem:[#allocation5 + $0x70] ss:$8 sps:$4 sm:$0xff]   ;;  %v1192_v19 = vld [vmem:[#allocation5 + $0x84] ss:$8 sps:$4 sm:$0xff]   ;;  %s1777_s11 = scalar_lea.hbm %s1829_s4, %s1094_s6 }
  0x73   : > { %480 = vmatprep.subr.bf16.mxu0 %v1174_v4  ;;  %v1216_v20 = vld [vmem:[#allocation7 + $0x4] ss:$8 sps:$4 sm:$0xff]   ;;  %v1218_v21 = vld [vmem:[#allocation7] ss:$8 sps:$4 sm:$0xff]   ;;  %v1219_v22 = vld [vmem:[#allocation7 + $0x14] ss:$8 sps:$4 sm:$0xff]  }
  0x74   : > { %508 = vmatprep.mubr.bf16.mxu0 %v265_v15  ;;  %778 = vmatprep.subr.bf16.mxu1 %v1216_v20  ;;  %v1221_v23 = vld [vmem:[#allocation7 + $0x10] ss:$8 sps:$4 sm:$0xff]   ;;  %v1194_v24 = vld [vmem:[#allocation5 + $0x80] ss:$8 sps:$4 sm:$0xff]   ;;  %v1222_v25 = vld [vmem:[#allocation7 + $0x24] ss:$8 sps:$4 sm:$0xff]  }
  0x75   : > { %779 = vmatpush1.bf16.msra.mxu1 %v1218_v21  ;;  %v1195_v26 = vld [vmem:[#allocation5 + $0x94] ss:$8 sps:$4 sm:$0xff]   ;;  %v1224_v27 = vld [vmem:[#allocation7 + $0x20] ss:$8 sps:$4 sm:$0xff]   ;;  %v1197_v28 = vld [vmem:[#allocation5 + $0x90] ss:$8 sps:$4 sm:$0xff]  }
  0x76   : > { %481 = vmatpush1.bf16.msra.mxu0 %v1176_v5  ;;  %780 = vmatprep.subr.bf16.mxu1 %v1219_v22  ;;  %v1225_v29 = vld [vmem:[#allocation7 + $0x34] ss:$8 sps:$4 sm:$0xff]   ;;  %v1198_v30 = vld [vmem:[#allocation5 + $0xa4] ss:$8 sps:$4 sm:$0xff]   ;;  %v1227_v31 = vld [vmem:[#allocation7 + $0x30] ss:$8 sps:$4 sm:$0xff]  }
  0x77   : > { %482 = vmatprep.subr.bf16.mxu0 %v1177_v6  ;;  %v1200_v32 = vld [vmem:[#allocation5 + $0xa0] ss:$8 sps:$4 sm:$0xff]   ;;  %v1228_v33 = vld [vmem:[#allocation7 + $0x44] ss:$8 sps:$4 sm:$0xff]   ;;  %v1201_v34 = vld [vmem:[#allocation5 + $0xb4] ss:$8 sps:$4 sm:$0xff]  }
  0x78   : > { %v1230_v35 = vld [vmem:[#allocation7 + $0x40] ss:$8 sps:$4 sm:$0xff]   ;;  %v1203_v36 = vld [vmem:[#allocation5 + $0xb0] ss:$8 sps:$4 sm:$0xff]   ;;  %v1231_v37 = vld [vmem:[#allocation7 + $0x54] ss:$8 sps:$4 sm:$0xff]  }
  0x79   : > { %781 = vmatpush1.bf16.msra.mxu1 %v1221_v23  ;;  %v1204_v38 = vld [vmem:[#allocation5 + $0xc4] ss:$8 sps:$4 sm:$0xff]   ;;  %v1233_v39 = vld [vmem:[#allocation7 + $0x50] ss:$8 sps:$4 sm:$0xff]   ;;  %v1206_v40 = vld [vmem:[#allocation5 + $0xc0] ss:$8 sps:$4 sm:$0xff]  }
  0x7a   : > { %483 = vmatpush1.bf16.msra.mxu0 %v1179_v7  ;;  %782 = vmatprep.subr.bf16.mxu1 %v1222_v25  ;;  %v1234_v41 = vld [vmem:[#allocation7 + $0x64] ss:$8 sps:$4 sm:$0xff]   ;;  %v1207_v42 = vld [vmem:[#allocation5 + $0xd4] ss:$8 sps:$4 sm:$0xff]   ;;  %v1236_v43 = vld [vmem:[#allocation7 + $0x60] ss:$8 sps:$4 sm:$0xff]  }
  0x7b   : > { %484 = vmatprep.subr.bf16.mxu0 %v1180_v8  ;;  %v1209_v44 = vld [vmem:[#allocation5 + $0xd0] ss:$8 sps:$4 sm:$0xff]   ;;  %v1237_v45 = vld [vmem:[#allocation7 + $0x74] ss:$8 sps:$4 sm:$0xff]   ;;  %v1210_v46 = vld [vmem:[#allocation5 + $0xe4] ss:$8 sps:$4 sm:$0xff]  }
  0x7c   : > { %v1239_v47 = vld [vmem:[#allocation7 + $0x70] ss:$8 sps:$4 sm:$0xff]   ;;  %v1212_v48 = vld [vmem:[#allocation5 + $0xe0] ss:$8 sps:$4 sm:$0xff]   ;;  %v1240_v49 = vld [vmem:[#allocation7 + $0x84] ss:$8 sps:$4 sm:$0xff]  }
  0x7d   : > { %783 = vmatpush1.bf16.msra.mxu1 %v1224_v27  ;;  %v1213_v50 = vld [vmem:[#allocation5 + $0xf4] ss:$8 sps:$4 sm:$0xff]   ;;  %v1215_v51 = vld [vmem:[#allocation5 + $0xf0] ss:$8 sps:$4 sm:$0xff]   ;;  %v1242_v52 = vld [vmem:[#allocation7 + $0x80] ss:$8 sps:$4 sm:$0xff]  }
  0x7e   : > { %485 = vmatpush1.bf16.msra.mxu0 %v1182_v9  ;;  %784 = vmatprep.subr.bf16.mxu1 %v1225_v29  ;;  %v1649_v54 = vld [vmem:[%s1627_s10 + $0x10] sm:$0xff]  ;;  %v1652_v56 = vld [vmem:[%s1627_s10 + $0x28] sm:$0xff]  ;;  %v1655_v57 = vld [vmem:[%s1627_s10 + $0x38] sm:$0xff]  ;;  %s914_s24 = sshll.u32 %s1733_s5, 4  ;;  %s900_s19 = scalar_lea.sflag [#allocation4], %s1621_s7  ;;  %s1779_s24 = int_to_ptr.vmem [resolvable:$true] %s914_s24 }
  0x7f   : > { %486 = vmatprep.subr.bf16.mxu0 %v1183_v10  ;;  %v1243_v55 = vld [vmem:[#allocation7 + $0x94] ss:$8 sps:$4 sm:$0xff]   ;;  %v264_v58 = vpack.c.bf16 %v1649_v54, %v1646_v53  ;;  %v1245_v59 = vld [vmem:[#allocation7 + $0x90] ss:$8 sps:$4 sm:$0xff]   ;;  %v267_v60 = vpack.c.bf16 %v1655_v57, %v1652_v56  ;;  %v1246_v61 = vld [vmem:[#allocation7 + $0xa4] ss:$8 sps:$4 sm:$0xff]  }
  0x80   : > { %v1248_v62 = vld [vmem:[#allocation7 + $0xa0] ss:$8 sps:$4 sm:$0xff]   ;;  %v1665_v0 = vld [vmem:[%s1627_s10 + $0x30] sm:$0xff]  ;;  %v1671_v3 = vld [vmem:[%s1627_s10 + $0x58] sm:$0xff]  ;;  %s1350_s12 = scalar_lea.vmem %s1779_s24, 2048  ;;  %s1429_s29 = smov [#allocation8]  }
  0x81   : > { %785 = vmatpush1.bf16.msra.mxu1 %v1227_v31  ;;  %v1662_v63 = vld [vmem:[%s1627_s10 + $0x20] sm:$0xff]  ;;  %v1249_v1 = vld [vmem:[#allocation7 + $0xb4] ss:$8 sps:$4 sm:$0xff]   ;;  %v1668_v2 = vld [vmem:[%s1627_s10 + $0x48] sm:$0xff]  ;;  %p1351_p1 = scmp.ne.s32.totalorder %s1779_s24, %s1350_s12  ;;  %s1354_s25 = sshll.u32 %s1429_s29, 4  ;;  %s1355_s25 = int_to_ptr.vmem [resolvable:$false] %s1354_s25 }
  0x82   : > { %487 = vmatpush1.bf16.msra.mxu0 %v1185_v11  ;;  %786 = vmatprep.subr.bf16.mxu1 %v1228_v33  ;;  %v266_v4 = vpack.c.bf16 %v1665_v0, %v1662_v63  ;;  %v1251_v5 = vld [vmem:[#allocation7 + $0xb0] ss:$8 sps:$4 sm:$0xff]   ;;  %v269_v6 = vpack.c.bf16 %v1671_v3, %v1668_v2  ;;  %v1252_v7 = vld [vmem:[#allocation7 + $0xc4] ss:$8 sps:$4 sm:$0xff]   ;;  %v1254_v8 = vld [vmem:[#allocation7 + $0xc0] ss:$8 sps:$4 sm:$0xff]   ;;  %p1357_p8 = scmp.lt.s32.totalorder %s1779_s24, %s1355_s25 }
  0x83   : > { %488 = vmatprep.subr.bf16.mxu0 %v1186_v12  ;;  %v1678_v9 = vld [vmem:[%s1627_s10 + $0x40] sm:$0xff]  ;;  %v1681_v10 = vld [vmem:[%s1627_s10 + $0x50] sm:$0xff]  ;;  %v1684_v12 = vld [vmem:[%s1627_s10 + $0x68] sm:$0xff]  ;;  %p1352_p2 = pnand %p1351_p1, %p1569_p4  ;;  %s1356_s8 = scalar_lea.vmem %s1355_s25, 4096 }
  0x84   : > { %v1255_v11 = vld [vmem:[#allocation7 + $0xd4] ss:$8 sps:$4 sm:$0xff]   ;;  %v1257_v21 = vld [vmem:[#allocation7 + $0xd0] ss:$8 sps:$4 sm:$0xff]   ;;  %v1258_v22 = vld [vmem:[#allocation7 + $0xe4] ss:$8 sps:$4 sm:$0xff]   ;;  %p1358_p13 = scmp.lt.s32.totalorder %s1356_s8, %s1350_s12 }
  0x85   : > { %787 = vmatpush1.bf16.msra.mxu1 %v1230_v35  ;;  %v1687_v15 = vld [vmem:[%s1627_s10 + $0x78] sm:$0xff]  ;;  %v1260_v23 = vld [vmem:[#allocation7 + $0xe0] ss:$8 sps:$4 sm:$0xff]   ;;  %p1353_p6 = pneg %p1352_p2 }
  0x86   : > { %489 = vmatpush1.bf16.msra.mxu0 %v1188_v16  ;;  %788 = vmatprep.subr.bf16.mxu1 %v1231_v37  ;;  %v268_v16 = vpack.c.bf16 %v1681_v10, %v1678_v9  ;;  %v1263_v25 = vld [vmem:[#allocation7 + $0xf0] ss:$8 sps:$4 sm:$0xff]   ;;  %v304_v29 = vld [vmem:[%s1828_s3] ss:$2 sm:$0x3]  ;;  %p1359_p3 = por %p1358_p13, %p1357_p8 }
  0x87   : > { %490 = vmatprep.subr.bf16.mxu0 %v1189_v17  ;;  %v271_v17 = vpack.c.bf16 %v1687_v15, %v1684_v12 }
  0x88   : > { %p1360_p7 = pnand %p1359_p3, %p1353_p6 }
  0x89   : > { %789 = vmatpush1.bf16.msra.mxu1 %v1233_v39 }
  0x8a   : > { %491 = vmatpush1.bf16.msra.mxu0 %v1191_v18  ;;  %790 = vmatprep.subr.bf16.mxu1 %v1234_v41  ;;  %v1694_v18 = vld [vmem:[%s1627_s10 + $0x60] sm:$0xff] }
  0x8b   : > { %492 = vmatprep.subr.bf16.mxu0 %v1192_v19  ;;  %v1697_v19 = vld [vmem:[%s1627_s10 + $0x70] sm:$0xff] }
  0x8c   : > { %v270_v20 = vpack.c.bf16 %v1697_v19, %v1694_v18 }
  0x8d   : > { %791 = vmatpush1.bf16.msra.mxu1 %v1236_v43 }
  0x8e   : > { %493 = vmatpush1.bf16.msra.mxu0 %v1194_v24  ;;  %792 = vmatprep.subr.bf16.mxu1 %v1237_v45  ;;  %v1261_v24 = vld [vmem:[#allocation7 + $0xf4] ss:$8 sps:$4 sm:$0xff]  }
  0x8f   : > { %494 = vmatprep.subr.bf16.mxu0 %v1195_v26  ;;  %v306_v26 = vlaneseq }
  0x91   : > { %793 = vmatpush1.bf16.msra.mxu1 %v1239_v47  ;;  %v1701_v27 = vshrl.u32 %v306_v26, 7 }
  0x92   : > { %495 = vmatpush1.bf16.msra.mxu0 %v1197_v28  ;;  %794 = vmatprep.subr.bf16.mxu1 %v1240_v49 }
  0x93   : > { %496 = vmatprep.subr.bf16.mxu0 %v1198_v30  ;;  %v308_v28 = vsub.s32 0, %v1701_v27  ;;  %v312_v30 = vsub.s32 1, %v1701_v27 }
  0x95   : > { %795 = vmatpush1.bf16.msra.mxu1 %v1242_v52  ;;  %v309_v31 = vrot.slane %v304_v29, %v308_v28 }
  0x96   : > { %497 = vmatpush1.bf16.msra.mxu0 %v1200_v32  ;;  %796 = vmatprep.subr.bf16.mxu1 %v1243_v55  ;;  %v313_v32 = vrot.slane %v304_v29, %v312_v30 }
  0x97   : > { %498 = vmatprep.subr.bf16.mxu0 %v1201_v34 }
  0x99   : > { %797 = vmatpush1.bf16.msra.mxu1 %v1245_v59 }
  0x9a   : > { %499 = vmatpush1.bf16.msra.mxu0 %v1203_v36  ;;  %798 = vmatprep.subr.bf16.mxu1 %v1246_v61 }
  0x9b   : > { %500 = vmatprep.subr.bf16.mxu0 %v1204_v38 }
  0x9d   : > { %799 = vmatpush1.bf16.msra.mxu1 %v1248_v62 }
  0x9e   : > { %501 = vmatpush1.bf16.msra.mxu0 %v1206_v40  ;;  %800 = vmatprep.subr.bf16.mxu1 %v1249_v1 }
  0x9f   : > { %502 = vmatprep.subr.bf16.mxu0 %v1207_v42 }
  0xa1   : > { %801 = vmatpush1.bf16.msra.mxu1 %v1251_v5 }
  0xa2   : > { %503 = vmatpush1.bf16.msra.mxu0 %v1209_v44  ;;  %802 = vmatprep.subr.bf16.mxu1 %v1252_v7 }
  0xa3   : > { %504 = vmatprep.subr.bf16.mxu0 %v1210_v46 }
  0xa5   : > { %803 = vmatpush1.bf16.msra.mxu1 %v1254_v8 }
  0xa6   : > { %505 = vmatpush1.bf16.msra.mxu0 %v1212_v48  ;;  %804 = vmatprep.subr.bf16.mxu1 %v1255_v11 }
  0xa7   : > { %506 = vmatprep.subr.bf16.mxu0 %v1213_v50 }
  0xa9   : > { %805 = vmatpush1.bf16.msra.mxu1 %v1257_v21 }
  0xaa   : > { %507 = vmatpush1.bf16.msra.mxu0 %v1215_v51  ;;  %806 = vmatprep.subr.bf16.mxu1 %v1258_v22 }
  0xad   : > { %509 = vmatmul.mubr.bf16.vlgmr.msra.gmra.mrb[0].mxu0 %v264_v58  ;;  %807 = vmatpush1.bf16.msra.mxu1 %v1260_v23 }
  0xae   : > { %518 = vmatprep.mubr.bf16.mxu0 %v267_v60  ;;  %808 = vmatprep.subr.bf16.mxu1 %v1261_v24 }
  0xb1   : > { %809 = vmatpush1.bf16.msra.mxu1 %v1263_v25 }
  0xb5   : > { %519 = vmatmul.mubr.bf16.gmra.mrb[4].mxu0 %v266_v4 }
  0xb6   : > { %528 = vmatprep.mubr.bf16.mxu0 %v269_v6 }
  0xbd   : > { %529 = vmatmul.mubr.bf16.gmra.mrb[8].mxu0 %v268_v16 }
  0xbe   : > { %538 = vmatprep.mubr.bf16.mxu0 %v271_v17 }
  0xc5   : > { %539 = vmatmul.mubr.bf16.gmra.mrb[12].mxu0 %v270_v20 }
 0x180   : > { %v510_v33 = vpop.f32.mrb[0].mxu0 }
 0x181   : > { %v511_v34 = vadd.f32 %v510_v33, %v309_v31  ;;  %v512_v35 = vpop.f32.mrb[1].mxu0 }
 0x182   : > { %v513_v36 = vadd.f32 %v512_v35, %v313_v32  ;;  %v514_v37 = vpop.f32.mrb[2].mxu0 }
 0x183   : > { %v515_v38 = vadd.f32 %v514_v37, %v309_v31  ;;  %v516_v39 = vpop.f32.mrb[3].mxu0  ;;  %v549_v41 = vmax.f32 %v511_v34, 0.0 }
 0x184   : > { %v517_v40 = vadd.f32 %v516_v39, %v313_v32  ;;  %v550_v43 = vmax.f32 %v513_v36, 0.0 }
 0x185   : > { %v551_v42 = vmax.f32 %v515_v38, 0.0 }
 0x186   : > { %v552_v44 = vmax.f32 %v517_v40, 0.0 }
 0x187   : > { %v565_v45 = vpack.c.bf16 %v551_v42, %v549_v41 }
 0x188   : > { %v520_v46 = vpop.f32.mrb[4].mxu0  ;;  %v566_v47 = vpack.c.bf16 %v552_v44, %v550_v43 }
 0x189   : > { %v521_v48 = vadd.f32 %v520_v46, %v309_v31  ;;  %v522_v49 = vpop.f32.mrb[5].mxu0  ;;  %v1052_v46 = vld [vmem:[%s1828_s3 + $0x1] ss:$2 sm:$0x3] }
 0x18a   : > { %v523_v50 = vadd.f32 %v522_v49, %v313_v32  ;;  %v524_v51 = vpop.f32.mrb[6].mxu0  ;;  %810 = vmatprep.mubr.bf16.mxu1 %v566_v47  ;;  %v1717_v47 = vrot.slane %v1052_v46, %v308_v28 }
 0x18b   : > { %v525_v52 = vadd.f32 %v524_v51, %v309_v31  ;;  %v526_v55 = vpop.f32.mrb[7].mxu0  ;;  %811 = vmatmul.mubr.bf16.vlgmr.msra.gmra.mrb[0].mxu1 %v565_v45  ;;  %v553_v59 = vmax.f32 %v521_v48, 0.0 }
 0x18c   : > { %v527_v58 = vadd.f32 %v526_v55, %v313_v32  ;;  %v554_v61 = vmax.f32 %v523_v50, 0.0 }
 0x18d   : > { %v555_v60 = vmax.f32 %v525_v52, 0.0 }
 0x18e   : > { %v556_v62 = vmax.f32 %v527_v58, 0.0 }
 0x18f   : > { %v567_v1 = vpack.c.bf16 %v555_v60, %v553_v59 }
 0x190   : > { %v568_v4 = vpack.c.bf16 %v556_v62, %v554_v61  ;;  %v530_v5 = vpop.f32.mrb[8].mxu0 }
 0x191   : > { %v531_v6 = vadd.f32 %v530_v5, %v309_v31  ;;  %v532_v7 = vpop.f32.mrb[9].mxu0 }
 0x192   : > { %v533_v8 = vadd.f32 %v532_v7, %v313_v32  ;;  %v534_v11 = vpop.f32.mrb[10].mxu0  ;;  %820 = vmatprep.mubr.bf16.mxu1 %v568_v4 }
 0x193   : > { %v535_v16 = vadd.f32 %v534_v11, %v309_v31  ;;  %v536_v17 = vpop.f32.mrb[11].mxu0  ;;  %821 = vmatmul.mubr.bf16.gmra.mrb[4].mxu1 %v567_v1  ;;  %v557_v21 = vmax.f32 %v531_v6, 0.0 }
 0x194   : > { %v537_v20 = vadd.f32 %v536_v17, %v313_v32  ;;  %v558_v23 = vmax.f32 %v533_v8, 0.0 }
 0x195   : > { %v559_v22 = vmax.f32 %v535_v16, 0.0 }
 0x196   : > { %v560_v24 = vmax.f32 %v537_v20, 0.0 }
 0x197   : > { %v569_v25 = vpack.c.bf16 %v559_v22, %v557_v21 }
 0x198   : > { %v570_v26 = vpack.c.bf16 %v560_v24, %v558_v23  ;;  %v540_v29 = vpop.f32.mrb[12].mxu0 }
 0x199   : > { %v541_v33 = vadd.f32 %v540_v29, %v309_v31  ;;  %v542_v34 = vpop.f32.mrb[13].mxu0 }
 0x19a   : > { %v543_v35 = vadd.f32 %v542_v34, %v313_v32  ;;  %v544_v36 = vpop.f32.mrb[14].mxu0  ;;  %830 = vmatprep.mubr.bf16.mxu1 %v570_v26 }
 0x19b   : > { %v545_v37 = vadd.f32 %v544_v36, %v309_v31  ;;  %v546_v38 = vpop.f32.mrb[15].mxu0  ;;  %831 = vmatmul.mubr.bf16.gmra.mrb[8].mxu1 %v569_v25  ;;  %v561_v40 = vmax.f32 %v541_v33, 0.0  ;;  %v1721_v31 = vrot.slane %v1052_v46, %v312_v30 }
 0x19c   : > { %v547_v39 = vadd.f32 %v546_v38, %v313_v32  ;;  %v562_v42 = vmax.f32 %v543_v35, 0.0 }
 0x19d   : > { %v563_v41 = vmax.f32 %v545_v37, 0.0 }
 0x19e   : > { %v564_v43 = vmax.f32 %v547_v39, 0.0 }
 0x19f   : > { %v571_v44 = vpack.c.bf16 %v563_v41, %v561_v40 }
 0x1a0   : > { %v572_v45 = vpack.c.bf16 %v564_v43, %v562_v42 }
 0x1a2   : > { %840 = vmatprep.mubr.bf16.mxu1 %v572_v45 }
 0x1a3   : > { %841 = vmatmul.mubr.bf16.gmra.mrb[12].mxu1 %v571_v44 }
 0x25e   : > { %v812_v32 = vpop.f32.mrb[0].mxu1 }
 0x25f   : > { %v813_v48 = vadd.f32 %v812_v32, %v1717_v47  ;;  %v814_v49 = vpop.f32.mrb[1].mxu1 }
 0x260   : > { %v815_v50 = vadd.f32 %v814_v49, %v1721_v31  ;;  %v816_v51 = vpop.f32.mrb[2].mxu1 }
 0x261   : > { %v851_v52 = vadd.f32 %v813_v48, %v1646_v53  ;;  %v817_v55 = vadd.f32 %v816_v51, %v1717_v47  ;;  %v818_v58 = vpop.f32.mrb[3].mxu1 }
 0x262   : > { %v852_v28 = vadd.f32 %v815_v50, %v1638_v13  ;;  %v819_v59 = vadd.f32 %v818_v58, %v1721_v31 }
 0x263   : > { %v867_v27 = vmax.f32 %v851_v52, 0.0  ;;  %v853_v30 = vadd.f32 %v817_v55, %v1649_v54 }
 0x264   : > { %v868_v60 = vmax.f32 %v852_v28, 0.0  ;;  %v854_v61 = vadd.f32 %v819_v59, %v1641_v14 }
 0x265   : > { %883 = vst [vmem:[%s1733_s5] sm:$0xff] %v867_v27  ;;  %v869_v53 = vmax.f32 %v853_v30, 0.0 }
 0x266   : > { %884 = vst [vmem:[%s1733_s5 + $0x8] sm:$0xff] %v868_v60  ;;  %v870_v62 = vmax.f32 %v854_v61, 0.0  ;;  %v822_v13 = vpop.f32.mrb[4].mxu1 }
 0x267   : > { %885 = vst [vmem:[%s1733_s5 + $0x10] sm:$0xff] %v869_v53  ;;  %v823_v1 = vadd.f32 %v822_v13, %v1717_v47  ;;  %v824_v54 = vpop.f32.mrb[5].mxu1 }
 0x268   : > { %886 = vst [vmem:[%s1733_s5 + $0x18] sm:$0xff] %v870_v62  ;;  %v825_v14 = vadd.f32 %v824_v54, %v1721_v31  ;;  %v826_v4 = vpop.f32.mrb[6].mxu1 }
 0x269   : > { %v855_v5 = vadd.f32 %v823_v1, %v1662_v63  ;;  %v827_v6 = vadd.f32 %v826_v4, %v1717_v47  ;;  %v828_v7 = vpop.f32.mrb[7].mxu1 }
 0x26a   : > { %v856_v8 = vadd.f32 %v825_v14, %v1652_v56  ;;  %v829_v11 = vadd.f32 %v828_v7, %v1721_v31 }
 0x26b   : > { %v871_v16 = vmax.f32 %v855_v5, 0.0  ;;  %v857_v17 = vadd.f32 %v827_v6, %v1665_v0 }
 0x26c   : > { %v872_v20 = vmax.f32 %v856_v8, 0.0  ;;  %v858_v21 = vadd.f32 %v829_v11, %v1655_v57 }
 0x26d   : > { %887 = vst [vmem:[%s1733_s5 + $0x20] sm:$0xff] %v871_v16  ;;  %v873_v22 = vmax.f32 %v857_v17, 0.0 }
 0x26e   : > { %888 = vst [vmem:[%s1733_s5 + $0x28] sm:$0xff] %v872_v20  ;;  %v874_v23 = vmax.f32 %v858_v21, 0.0  ;;  %v832_v24 = vpop.f32.mrb[8].mxu1 }
 0x26f   : > { %889 = vst [vmem:[%s1733_s5 + $0x30] sm:$0xff] %v873_v22  ;;  %v833_v63 = vadd.f32 %v832_v24, %v1717_v47  ;;  %v834_v25 = vpop.f32.mrb[9].mxu1 }
 0x270   : > { %890 = vst [vmem:[%s1733_s5 + $0x38] sm:$0xff] %v874_v23  ;;  %v835_v56 = vadd.f32 %v834_v25, %v1721_v31  ;;  %v836_v26 = vpop.f32.mrb[10].mxu1 }
 0x271   : > { %v859_v0 = vadd.f32 %v833_v63, %v1678_v9  ;;  %v837_v57 = vadd.f32 %v836_v26, %v1717_v47  ;;  %v838_v29 = vpop.f32.mrb[11].mxu1 }
 0x272   : > { %v860_v33 = vadd.f32 %v835_v56, %v1668_v2  ;;  %v839_v34 = vadd.f32 %v838_v29, %v1721_v31 }
 0x273   : > { %v875_v35 = vmax.f32 %v859_v0, 0.0  ;;  %v861_v36 = vadd.f32 %v837_v57, %v1681_v10 }
 0x274   : > { %v876_v37 = vmax.f32 %v860_v33, 0.0  ;;  %v862_v38 = vadd.f32 %v839_v34, %v1671_v3 }
 0x275   : > { %891 = vst [vmem:[%s1733_s5 + $0x40] sm:$0xff] %v875_v35  ;;  %v877_v39 = vmax.f32 %v861_v36, 0.0 }
 0x276   : > { %892 = vst [vmem:[%s1733_s5 + $0x48] sm:$0xff] %v876_v37  ;;  %v878_v9 = vmax.f32 %v862_v38, 0.0  ;;  %v842_v40 = vpop.f32.mrb[12].mxu1 }
 0x277   : > { %893 = vst [vmem:[%s1733_s5 + $0x50] sm:$0xff] %v877_v39  ;;  %v843_v41 = vadd.f32 %v842_v40, %v1717_v47  ;;  %v844_v2 = vpop.f32.mrb[13].mxu1 }
 0x278   : > { %894 = vst [vmem:[%s1733_s5 + $0x58] sm:$0xff] %v878_v9  ;;  %v845_v42 = vadd.f32 %v844_v2, %v1721_v31  ;;  %v846_v43 = vpop.f32.mrb[14].mxu1 }
 0x279   : > { %v863_v10 = vadd.f32 %v843_v41, %v1694_v18  ;;  %v847_v3 = vadd.f32 %v846_v43, %v1717_v47  ;;  %v848_v44 = vpop.f32.mrb[15].mxu1 }
 0x27a   : > { %v864_v45 = vadd.f32 %v845_v42, %v1684_v12  ;;  %v849_v46 = vadd.f32 %v848_v44, %v1721_v31 }
 0x27b   : > { %v879_v32 = vmax.f32 %v863_v10, 0.0  ;;  %v865_v48 = vadd.f32 %v847_v3, %v1697_v19 }
 0x27c   : > { %v880_v49 = vmax.f32 %v864_v45, 0.0  ;;  %v866_v50 = vadd.f32 %v849_v46, %v1687_v15 }
 0x27d   : > { %895 = vst [vmem:[%s1733_s5 + $0x60] sm:$0xff] %v879_v32  ;;  %v881_v18 = vmax.f32 %v865_v48, 0.0 }
 0x27e   : > { %896 = vst [vmem:[%s1733_s5 + $0x68] sm:$0xff] %v880_v49  ;;  %v882_v12 = vmax.f32 %v866_v50, 0.0 }
 0x27f   : > { %897 = vst [vmem:[%s1733_s5 + $0x70] sm:$0xff] %v881_v18 }
 0x280   : > { %898 = vst [vmem:[%s1733_s5 + $0x78] sm:$0xff] %v882_v12 }
 0x281   : > { %1363 = shalt.err (!%p1360_p7)
}
 0x282   : > { %s1364_s26 = scalar_lea.hbm %s1777_s11, 2048  ;;  %s1368_s23 = scalar_lea.hbm %s1829_s4, 8192 }
 0x283   : > { %p1365_p9 = scmp.ne.s32.totalorder %s1777_s11, %s1364_s26  ;;  %p1369_p5 = scmp.lt.u32.totalorder %s1777_s11, %s1829_s4 }
 0x284   : > { %p1370_p10 = scmp.lt.u32.totalorder %s1368_s23, %s1364_s26  ;;  %p1372_p1 = scmp.lt.u32.totalorder %s1364_s26, %s1777_s11 }
 0x285   : > { %p1366_p12 = pnand %p1365_p9, %p1569_p4 }
 0x286   : > { %p1371_p11 = por %p1370_p10, %p1369_p5 }
 0x287   : > { %p1367_p0 = pneg %p1366_p12 }
 0x288   : > { %p1373_p2 = por %p1372_p1, %p1371_p11 }
 0x28a   : > { %p1374_p6 = pnand %p1373_p2, %p1367_p0 }
 0x28c   : > { %1377 = shalt.err (!%p1374_p6)
}
 0x28d   : > { %s1430_s5 = smov 256   ;;  %s1431_s6 = smov 16  }
 0x28e   : > { %1105 = dma.vmem_to_hbm [thread:$0]  (%p1569_p4), %s1779_s24, 2048, %s1777_s11, %s900_s19, %s1430_s5, %s1430_s5, %s1431_s6  }
 0x28f PF: > { %p1127_p8 = scmp.ge.s32.totalorder %s1420_s18, 2  ;;  %s929_s20 = sand.u32 1, %s1408_s15  }
 0x290   : > { %p1844_p13 = scmp.ne.s32.totalorder %s1834_s22, 0  ;;  %s930_s28 = scalar_lea.sflag [#allocation4], %s929_s20 }
 0x292   : > { %p1119_p3 = pnand %p1127_p8, %p1844_p13 }
 0x294   : > { %1403 = dma.done.wait (!%p1119_p3), %s930_s28, 2048  }
 0x295   : > { %1405 = vsyncadd (!%p1119_p3), %s930_s28, 4294965248  ;;  %p18_p7 = scmp.ge.s32.totalorder %s1559_s9, 6   ;;  %s1845_s15 = smov %s1412_s16 }
 0x296   : > { %s1846_s16 = smov %s1416_s17  ;;  %s1847_s17 = smov %s1575_s14 }
 0x297   : > { %s1848_s18 = smov %s1559_s9  ;;  %20 = sbr.rel (!%p18_p7) target bundleno = 6 (0x6), region = 90 }
 0x29e   :  { %935 = vsyncpa [#allocation3], 1 }
 0x29f   :  { %937 = vsyncpa [#allocation3 + $0x1], 1 }
 0x2a0   :  { %938 = vsyncpa [#allocation6], 1 }
 0x2a1   :  { %939 = vsyncpa [#allocation4], 1 }
 0x2a2   :  { %941 = vsyncpa [#allocation4 + $0x1], 1 }

</bundles_post_ra>
